<compile_context>
chip_gen: v5e
topology: v5e:2x2
jax: 0.10.0
libtpu: 0.0.40
codegen_flags: <defaults>
</compile_context>

<pallas_src>
import numpy as np

import jax
import jax.numpy as jnp
from jax import lax
from jax.experimental import pallas as pl
from jax.experimental.pallas import tpu as pltpu


_SUB = 8  # f32 sublane tile height: every row offset / split below is a multiple of it


def _ceil_to(x, m):
    return -(-int(x) // m) * m


class _SlabPacker:
    """Packs many small 2-D f32 parameter arrays into one lane-dense slab.

    Every entry starts at a sublane-aligned (multiple-of-8) row offset so the in-kernel
    static `ref[off:off+rows, 0:cols]` views never need a relayout, and the whole slab
    moves HBM->VMEM with a single DMA."""

    def __init__(self, lanes):
        self.lanes = int(lanes)
        self._blocks = []
        self._off = 0

    def add(self, arr):
        arr = np.asarray(arr, np.float32)
        rows, cols = arr.shape
        assert cols <= self.lanes
        rows_pad = _ceil_to(rows, _SUB)
        blk = np.zeros((rows_pad, self.lanes), np.float32)
        blk[:rows, :cols] = arr
        off = self._off
        self._blocks.append(blk)
        self._off += rows_pad
        return off

    def finish(self):
        return jnp.asarray(np.concatenate(self._blocks, axis=0))


def _pool_selector(batch, length, pad, r_in, final, grp):
    """0/1 selection matrix [Se; So] of shape (2*half, r_in).

    Se / So pick the even / odd time samples of every batch element's conv output so
    that max(Se @ y, So @ y) realises MaxPool1d(2, 2).  For non-final blocks the
    destination rows already contain the next block's 'same' zero padding (P all-zero
    rows per sample edge); for the final block the destination is time-major with `grp`
    rows per time step so the FC flatten only needs 8-aligned slices.  `half` is always
    a multiple of 8 so the in-kernel even/odd split lands on a sublane-tile boundary."""
    lh = length // 2
    stride_in = length + 2 * pad            # per-sample stride of the conv-output rows
    if final:
        half = lh * grp
        dst = lambda b, p: p * grp + b
    else:
        stride_out = lh + 2 * pad
        half = _ceil_to(batch * stride_out, _SUB)
        dst = lambda b, p: b * stride_out + pad + p
    se = np.zeros((half, r_in), np.float32)
    so = np.zeros((half, r_in), np.float32)
    for b in range(batch):
        for p in range(lh):
            src = b * stride_in + 2 * p
            se[dst(b, p), src] = 1.0
            so[dst(b, p), src + 1] = 1.0
    return np.concatenate([se, so], axis=0), half


def _make_fused_kernel(K, blocks, fc_layers, lred, grp, batch):
    """Builds the fused forward kernel; all shapes/offsets are static closure ints."""

    def kernel(x_ref, w_ref, q_ref, p_ref, o_ref):
        xp = x_ref[...]                                        # (R0, Cin0) activation slab
        for blk in blocks:
            rv, kc, cout = blk["rv"], blk["kc"], blk["cout"]
            # Conv1d('same') as ONE matmul: im2col slab = lane-concat of the K shifted
            # row windows; eval-mode BN scale is already folded into the weights.
            taps = [xp[k:k + rv, :] for k in range(K)]
            slab = taps[0] if K == 1 else jnp.concatenate(taps, axis=1)   # (rv, K*Cin)
            w = w_ref[blk["woff"]:blk["woff"] + kc, 0:cout]
            y = jnp.dot(slab, w, preferred_element_type=jnp.float32)      # (rv, Cout)
            # Folded BN/bias shift + ReLU.
            y = jnp.maximum(y + p_ref[blk["soff"]:blk["soff"] + 1, 0:cout], 0.0)
            # MaxPool1d(2,2) + next block's zero padding: one 0/1 selector matmul with
            # an 8-aligned half split (no relayout before the max).
            half = blk["half"]
            q = q_ref[blk["qoff"]:blk["qoff"] + 2 * half, 0:rv]
            sel = jnp.dot(q, y, preferred_element_type=jnp.float32)       # (2*half, Cout)
            xp = jnp.maximum(sel[0:half, :], sel[half:2 * half, :])       # next slab

        # FC head.  The final slab is time-major with `grp` rows per time step, so the
        # PyTorch channel-major flatten is just a lane-concat of 8-aligned row groups
        # (the first FC weight was row-permuted to match at prep time) -> a single dot
        # with a Lred*C_last-deep contraction.
        if lred > 1:
            h = jnp.concatenate([xp[t * grp:(t + 1) * grp, :] for t in range(lred)],
                                axis=1)                                   # (grp, Lred*C)
        else:
            h = xp
        for (in_f, out_f, woff, boff, relu) in fc_layers:
            w = p_ref[woff:woff + in_f, 0:out_f]
            b = p_ref[boff:boff + 1, 0:out_f]
            h = jnp.dot(h, w, preferred_element_type=jnp.float32) + b
            if relu:
                h = jnp.maximum(h, 0.0)
        # dropout(p=0.25) layers are identity in eval mode
        o_ref[...] = h[0:batch, :].astype(o_ref.dtype)

    return kernel


def tstr_classifier_forward(x_ncl, params):
    """x_ncl: (B, C, L) exactly like the PyTorch module's input. One fused pallas_call."""
    x_ncl = jnp.asarray(x_ncl, jnp.float32)
    B, cin0, L0 = (int(d) for d in x_ncl.shape)
    num_blocks = len(params["conv"])
    K = int(params["conv"][0][0].shape[0])
    P = K // 2
    assert K % 2 == 1, "kernel_size must be odd ('same' padding)"
    grp = _ceil_to(B, _SUB)

    cmax = max(int(w.shape[2]) for (w, _, _) in params["conv"])
    p_lanes = max([cmax] + [int(w.shape[1]) for (w, _) in params["fc"]]
                  + [int(params["fc_class"][0].shape[1])])
    w_pack = _SlabPacker(cmax)      # all conv weights (BN scale folded in)
    p_pack = _SlabPacker(p_lanes)   # shifts + FC weights + biases

    # ---- batch-folded, zero-padded, channels-last input slab (one DMA) ----
    x_blc = jnp.transpose(x_ncl, (0, 2, 1))                    # (B, L0, Cin)
    x_pad = jnp.pad(x_blc, ((0, 0), (P, P), (0, 0)))           # 'same' zero padding
    x_slab = x_pad.reshape(B * (L0 + 2 * P), cin0)
    R = _ceil_to(B * (L0 + 2 * P), _SUB)
    if R > x_slab.shape[0]:
        x_slab = jnp.pad(x_slab, ((0, R - x_slab.shape[0]), (0, 0)))

    # ---- static per-block geometry + parameter packing ----
    blocks, q_mats = [], []
    L = L0
    for i, (w, scale, shift) in enumerate(params["conv"]):
        assert L % 2 == 0, "time length must stay even for MaxPool1d(2, 2)"
        k_, cin, cout = (int(d) for d in w.shape)
        assert k_ == K
        final = (i == num_blocks - 1)
        rv = R - 2 * P                                          # conv-output rows
        w_fold = (np.asarray(w, np.float32)
                  * np.asarray(scale, np.float32)[None, None, :]).reshape(K * cin, cout)
        q, half = _pool_selector(B, L, P, rv, final, grp)
        blocks.append(dict(rv=rv, kc=K * cin, cout=cout, half=half,
                           woff=w_pack.add(w_fold),
                           soff=p_pack.add(np.asarray(shift, np.float32).reshape(1, cout))))
        q_mats.append(q)
        R = half                                                # rows of the next slab
        L //= 2
    lred, c_last = L, blocks[-1]["cout"]

    q_pack = _SlabPacker(max(b["rv"] for b in blocks))          # all pool/pad selectors
    for blk, q in zip(blocks, q_mats):
        blk["qoff"] = q_pack.add(q)

    # FC head: fold the PyTorch (B, C, Lred) channel-major flatten into a row
    # permutation of the first FC weight (zero runtime cost) and pack everything.
    fc_layers, in_f = [], lred * c_last
    fc_all = list(params["fc"]) + [params["fc_class"]]
    for j, (wj, bj) in enumerate(fc_all):
        out_f = int(wj.shape[1])
        assert int(wj.shape[0]) == in_f
        wj_np = np.asarray(wj, np.float32)
        if j == 0:
            wj_np = wj_np.reshape(c_last, lred, out_f).transpose(1, 0, 2)
            wj_np = wj_np.reshape(lred * c_last, out_f)
        fc_layers.append((in_f, out_f, p_pack.add(wj_np),
                          p_pack.add(np.asarray(bj, np.float32).reshape(1, out_f)),
                          j < len(fc_all) - 1))
        in_f = out_f
    num_classes = fc_layers[-1][1]

    kernel = _make_fused_kernel(K, blocks, fc_layers, lred, grp, B)
    return pl.pallas_call(
        kernel,
        out_shape=jax.ShapeDtypeStruct((B, num_classes), jnp.float32),
        in_specs=[pl.BlockSpec(memory_space=pltpu.MemorySpace.VMEM)] * 4,
        out_specs=pl.BlockSpec(memory_space=pltpu.MemorySpace.VMEM),
    )(x_slab, w_pack.finish(), q_pack.finish(), p_pack.finish())


def init_params(key, num_channels, conv_channels, kernel_size, reduced_timesteps,
                hidden_sizes, num_classes):
    """Deterministic synthetic parameters (eval-mode BN expressed as scale/shift)."""
    eps = 1e-5
    params = {"conv": [], "fc": []}
    in_c = num_channels
    for out_c in conv_channels:
        key, kw, kb, kg, kbeta = jax.random.split(key, 5)
        w = 0.1 * jax.random.normal(kw, (kernel_size, in_c, out_c), jnp.float32)
        bias = 0.1 * jax.random.normal(kb, (out_c,), jnp.float32)
        gamma = 1.0 + 0.1 * jax.random.normal(kg, (out_c,), jnp.float32)
        beta = 0.1 * jax.random.normal(kbeta, (out_c,), jnp.float32)
        running_mean = jnp.zeros((out_c,), jnp.float32)   # PyTorch BN defaults
        running_var = jnp.ones((out_c,), jnp.float32)
        scale = gamma / jnp.sqrt(running_var + eps)
        shift = beta + (bias - running_mean) * scale
        params["conv"].append((w, scale, shift))
        in_c = out_c

    in_f = reduced_timesteps * conv_channels[-1]
    for h in hidden_sizes:
        key, kw, kb = jax.random.split(key, 3)
        params["fc"].append((0.1 * jax.random.normal(kw, (in_f, h), jnp.float32),
                             0.1 * jax.random.normal(kb, (h,), jnp.float32)))
        in_f = h
    key, kw, kb = jax.random.split(key, 3)
    params["fc_class"] = (0.1 * jax.random.normal(kw, (in_f, num_classes), jnp.float32),
                          0.1 * jax.random.normal(kb, (num_classes,), jnp.float32))
    return params


def reference_forward(x_ncl, params):
    """Plain-JAX reference with identical (eval-mode) semantics for validation."""
    x = x_ncl
    for (w, scale, shift) in params["conv"]:
        K = w.shape[0]
        P = K // 2
        w_oik = jnp.transpose(w, (2, 1, 0))             # (Cout, Cin, K)
        y = lax.conv_general_dilated(x, w_oik, window_strides=(1,), padding=[(P, P)],
                                     dimension_numbers=("NCH", "OIH", "NCH"),
                                     precision=lax.Precision.HIGHEST)
        y = y * scale[None, :, None] + shift[None, :, None]
        y = jnp.maximum(y, 0.0)
        B, C, L = y.shape
        x = jnp.max(y.reshape(B, C, L // 2, 2), axis=-1)
    x = x.reshape(x.shape[0], -1)
    for (w, b) in params["fc"]:
        x = jnp.maximum(jnp.dot(x, w, precision=lax.Precision.HIGHEST) + b, 0.0)
    w, b = params["fc_class"]
    return jnp.dot(x, w, precision=lax.Precision.HIGHEST) + b


if __name__ == "__main__":
    # Small shapes consistent with the module's constructor arguments.
    batch = 2
    num_channels = 3
    num_timesteps = 64
    conv_channels = [8, 16, 32, 64]
    kernel_size = 5
    hidden_sizes = [32]
    num_classes = 5

    reduced_timesteps = num_timesteps
    for _ in conv_channels:
        reduced_timesteps = (reduced_timesteps - 1) // 2 + 1  # MaxPool1d(2,2) on even L

    key = jax.random.PRNGKey(0)
    key, kx = jax.random.split(key)
    x = jax.random.normal(kx, (batch, num_channels, num_timesteps), jnp.float32)  # NCL

    params = init_params(key, num_channels, conv_channels, kernel_size,
                         reduced_timesteps, hidden_sizes, num_classes)

    out = jax.block_until_ready(tstr_classifier_forward(x, params))
    ref = jax.block_until_ready(reference_forward(x, params))

    assert out.shape == (batch, num_classes)
    if not jnp.allclose(out, ref, atol=2e-3, rtol=2e-3):
        raise AssertionError(
            f"kernel/reference mismatch: max abs diff = {jnp.max(jnp.abs(out - ref))}")
    print("KERNEL_OK")
</pallas_src>

<mosaic_0001>
module attributes {stable_mosaic.version = 11 : i64} {
  func.func @kernel(%arg0: memref<136x3xf32, #tpu.memory_space<vmem>>, %arg1: memref<296x64xf32, #tpu.memory_space<vmem>>, %arg2: memref<336x132xf32, #tpu.memory_space<vmem>>, %arg3: memref<336x64xf32, #tpu.memory_space<vmem>>, %arg4: memref<2x5xf32, #tpu.memory_space<vmem>>) attributes {dimension_semantics = [], scalar_prefetch = 0 : i64, scratch_operands = 0 : i64, tpu.core_type = #tpu.core_type<tc>} {
    %c0 = arith.constant 0 : index
    %c0_0 = arith.constant 0 : index
    %0 = vector.load %arg0[%c0, %c0_0] : memref<136x3xf32, #tpu.memory_space<vmem>>, vector<136x3xf32>
    %1 = vector.extract_strided_slice %0 {offsets = [0, 0], sizes = [132, 3], strides = [1, 1]} : vector<136x3xf32> to vector<132x3xf32>
    %2 = vector.extract_strided_slice %0 {offsets = [1, 0], sizes = [132, 3], strides = [1, 1]} : vector<136x3xf32> to vector<132x3xf32>
    %3 = vector.extract_strided_slice %0 {offsets = [2, 0], sizes = [132, 3], strides = [1, 1]} : vector<136x3xf32> to vector<132x3xf32>
    %4 = vector.extract_strided_slice %0 {offsets = [3, 0], sizes = [132, 3], strides = [1, 1]} : vector<136x3xf32> to vector<132x3xf32>
    %5 = vector.extract_strided_slice %0 {offsets = [4, 0], sizes = [132, 3], strides = [1, 1]} : vector<136x3xf32> to vector<132x3xf32>
    %6 = tpu.concatenate %1, %2, %3, %4, %5 in 1 : vector<132x3xf32>, vector<132x3xf32>, vector<132x3xf32>, vector<132x3xf32>, vector<132x3xf32> -> vector<132x15xf32>
    %c0_1 = arith.constant 0 : index
    %c0_2 = arith.constant 0 : index
    %7 = vector.load %arg1[%c0_1, %c0_2] : memref<296x64xf32, #tpu.memory_space<vmem>>, vector<15x8xf32>
    %cst = arith.constant dense<0.000000e+00> : vector<132x8xf32>
    %8 = tpu.matmul %6, %7, %cst {dimension_numbers = #tpu.dot_dimension_numbers<[1], [0], [0], [1], [0, 0, 1, 1], [], []>} : vector<132x15xf32>, vector<15x8xf32>, vector<132x8xf32> -> vector<132x8xf32>
    %c0_3 = arith.constant 0 : index
    %c0_4 = arith.constant 0 : index
    %9 = vector.load %arg3[%c0_3, %c0_4] : memref<336x64xf32, #tpu.memory_space<vmem>>, vector<1x8xf32>
    %10 = vector.broadcast %9 : vector<1x8xf32> to vector<132x8xf32>
    %11 = arith.addf %8, %10 : vector<132x8xf32>
    %cst_5 = arith.constant 0.000000e+00 : f32
    %12 = vector.broadcast %cst_5 : f32 to vector<132x8xf32>
    %13 = arith.maximumf %11, %12 : vector<132x8xf32>
    %c0_6 = arith.constant 0 : index
    %c0_7 = arith.constant 0 : index
    %14 = vector.load %arg2[%c0_6, %c0_7] : memref<336x132xf32, #tpu.memory_space<vmem>>, vector<144x132xf32>
    %cst_8 = arith.constant dense<0.000000e+00> : vector<144x8xf32>
    %15 = tpu.matmul %14, %13, %cst_8 {dimension_numbers = #tpu.dot_dimension_numbers<[1], [0], [0], [1], [0, 0, 1, 1], [], []>} : vector<144x132xf32>, vector<132x8xf32>, vector<144x8xf32> -> vector<144x8xf32>
    %16 = vector.extract_strided_slice %15 {offsets = [0, 0], sizes = [72, 8], strides = [1, 1]} : vector<144x8xf32> to vector<72x8xf32>
    %17 = vector.extract_strided_slice %15 {offsets = [72, 0], sizes = [72, 8], strides = [1, 1]} : vector<144x8xf32> to vector<72x8xf32>
    %18 = arith.maximumf %16, %17 : vector<72x8xf32>
    %19 = vector.extract_strided_slice %18 {offsets = [0, 0], sizes = [68, 8], strides = [1, 1]} : vector<72x8xf32> to vector<68x8xf32>
    %20 = vector.extract_strided_slice %18 {offsets = [1, 0], sizes = [68, 8], strides = [1, 1]} : vector<72x8xf32> to vector<68x8xf32>
    %21 = vector.extract_strided_slice %18 {offsets = [2, 0], sizes = [68, 8], strides = [1, 1]} : vector<72x8xf32> to vector<68x8xf32>
    %22 = vector.extract_strided_slice %18 {offsets = [3, 0], sizes = [68, 8], strides = [1, 1]} : vector<72x8xf32> to vector<68x8xf32>
    %23 = vector.extract_strided_slice %18 {offsets = [4, 0], sizes = [68, 8], strides = [1, 1]} : vector<72x8xf32> to vector<68x8xf32>
    %24 = tpu.concatenate %19, %20, %21, %22, %23 in 1 : vector<68x8xf32>, vector<68x8xf32>, vector<68x8xf32>, vector<68x8xf32>, vector<68x8xf32> -> vector<68x40xf32>
    %c16 = arith.constant 16 : index
    %c0_9 = arith.constant 0 : index
    %25 = vector.load %arg1[%c16, %c0_9] : memref<296x64xf32, #tpu.memory_space<vmem>>, vector<40x16xf32>
    %cst_10 = arith.constant dense<0.000000e+00> : vector<68x16xf32>
    %26 = tpu.matmul %24, %25, %cst_10 {dimension_numbers = #tpu.dot_dimension_numbers<[1], [0], [0], [1], [0, 0, 1, 1], [], []>} : vector<68x40xf32>, vector<40x16xf32>, vector<68x16xf32> -> vector<68x16xf32>
    %c8 = arith.constant 8 : index
    %c0_11 = arith.constant 0 : index
    %27 = vector.load %arg3[%c8, %c0_11] : memref<336x64xf32, #tpu.memory_space<vmem>>, vector<1x16xf32>
    %28 = vector.broadcast %27 : vector<1x16xf32> to vector<68x16xf32>
    %29 = arith.addf %26, %28 : vector<68x16xf32>
    %cst_12 = arith.constant 0.000000e+00 : f32
    %30 = vector.broadcast %cst_12 : f32 to vector<68x16xf32>
    %31 = arith.maximumf %29, %30 : vector<68x16xf32>
    %c144 = arith.constant 144 : index
    %c0_13 = arith.constant 0 : index
    %32 = vector.load %arg2[%c144, %c0_13] : memref<336x132xf32, #tpu.memory_space<vmem>>, vector<80x68xf32>
    %cst_14 = arith.constant dense<0.000000e+00> : vector<80x16xf32>
    %33 = tpu.matmul %32, %31, %cst_14 {dimension_numbers = #tpu.dot_dimension_numbers<[1], [0], [0], [1], [0, 0, 1, 1], [], []>} : vector<80x68xf32>, vector<68x16xf32>, vector<80x16xf32> -> vector<80x16xf32>
    %34 = vector.extract_strided_slice %33 {offsets = [0, 0], sizes = [40, 16], strides = [1, 1]} : vector<80x16xf32> to vector<40x16xf32>
    %35 = vector.extract_strided_slice %33 {offsets = [40, 0], sizes = [40, 16], strides = [1, 1]} : vector<80x16xf32> to vector<40x16xf32>
    %36 = arith.maximumf %34, %35 : vector<40x16xf32>
    %37 = vector.extract_strided_slice %36 {offsets = [0, 0], sizes = [36, 16], strides = [1, 1]} : vector<40x16xf32> to vector<36x16xf32>
    %38 = vector.extract_strided_slice %36 {offsets = [1, 0], sizes = [36, 16], strides = [1, 1]} : vector<40x16xf32> to vector<36x16xf32>
    %39 = vector.extract_strided_slice %36 {offsets = [2, 0], sizes = [36, 16], strides = [1, 1]} : vector<40x16xf32> to vector<36x16xf32>
    %40 = vector.extract_strided_slice %36 {offsets = [3, 0], sizes = [36, 16], strides = [1, 1]} : vector<40x16xf32> to vector<36x16xf32>
    %41 = vector.extract_strided_slice %36 {offsets = [4, 0], sizes = [36, 16], strides = [1, 1]} : vector<40x16xf32> to vector<36x16xf32>
    %42 = tpu.concatenate %37, %38, %39, %40, %41 in 1 : vector<36x16xf32>, vector<36x16xf32>, vector<36x16xf32>, vector<36x16xf32>, vector<36x16xf32> -> vector<36x80xf32>
    %c56 = arith.constant 56 : index
    %c0_15 = arith.constant 0 : index
    %43 = vector.load %arg1[%c56, %c0_15] : memref<296x64xf32, #tpu.memory_space<vmem>>, vector<80x32xf32>
    %cst_16 = arith.constant dense<0.000000e+00> : vector<36x32xf32>
    %44 = tpu.matmul %42, %43, %cst_16 {dimension_numbers = #tpu.dot_dimension_numbers<[1], [0], [0], [1], [0, 0, 1, 1], [], []>} : vector<36x80xf32>, vector<80x32xf32>, vector<36x32xf32> -> vector<36x32xf32>
    %c16_17 = arith.constant 16 : index
    %c0_18 = arith.constant 0 : index
    %45 = vector.load %arg3[%c16_17, %c0_18] : memref<336x64xf32, #tpu.memory_space<vmem>>, vector<1x32xf32>
    %46 = vector.broadcast %45 : vector<1x32xf32> to vector<36x32xf32>
    %47 = arith.addf %44, %46 : vector<36x32xf32>
    %cst_19 = arith.constant 0.000000e+00 : f32
    %48 = vector.broadcast %cst_19 : f32 to vector<36x32xf32>
    %49 = arith.maximumf %47, %48 : vector<36x32xf32>
    %c224 = arith.constant 224 : index
    %c0_20 = arith.constant 0 : index
    %50 = vector.load %arg2[%c224, %c0_20] : memref<336x132xf32, #tpu.memory_space<vmem>>, vector<48x36xf32>
    %cst_21 = arith.constant dense<0.000000e+00> : vector<48x32xf32>
    %51 = tpu.matmul %50, %49, %cst_21 {dimension_numbers = #tpu.dot_dimension_numbers<[1], [0], [0], [1], [0, 0, 1, 1], [], []>} : vector<48x36xf32>, vector<36x32xf32>, vector<48x32xf32> -> vector<48x32xf32>
    %52 = vector.extract_strided_slice %51 {offsets = [0, 0], sizes = [24, 32], strides = [1, 1]} : vector<48x32xf32> to vector<24x32xf32>
    %53 = vector.extract_strided_slice %51 {offsets = [24, 0], sizes = [24, 32], strides = [1, 1]} : vector<48x32xf32> to vector<24x32xf32>
    %54 = arith.maximumf %52, %53 : vector<24x32xf32>
    %55 = vector.extract_strided_slice %54 {offsets = [0, 0], sizes = [20, 32], strides = [1, 1]} : vector<24x32xf32> to vector<20x32xf32>
    %56 = vector.extract_strided_slice %54 {offsets = [1, 0], sizes = [20, 32], strides = [1, 1]} : vector<24x32xf32> to vector<20x32xf32>
    %57 = vector.extract_strided_slice %54 {offsets = [2, 0], sizes = [20, 32], strides = [1, 1]} : vector<24x32xf32> to vector<20x32xf32>
    %58 = vector.extract_strided_slice %54 {offsets = [3, 0], sizes = [20, 32], strides = [1, 1]} : vector<24x32xf32> to vector<20x32xf32>
    %59 = vector.extract_strided_slice %54 {offsets = [4, 0], sizes = [20, 32], strides = [1, 1]} : vector<24x32xf32> to vector<20x32xf32>
    %60 = tpu.concatenate %55, %56, %57, %58, %59 in 1 : vector<20x32xf32>, vector<20x32xf32>, vector<20x32xf32>, vector<20x32xf32>, vector<20x32xf32> -> vector<20x160xf32>
    %c136 = arith.constant 136 : index
    %c0_22 = arith.constant 0 : index
    %61 = vector.load %arg1[%c136, %c0_22] : memref<296x64xf32, #tpu.memory_space<vmem>>, vector<160x64xf32>
    %cst_23 = arith.constant dense<0.000000e+00> : vector<20x64xf32>
    %62 = tpu.matmul %60, %61, %cst_23 {dimension_numbers = #tpu.dot_dimension_numbers<[1], [0], [0], [1], [0, 0, 1, 1], [], []>} : vector<20x160xf32>, vector<160x64xf32>, vector<20x64xf32> -> vector<20x64xf32>
    %c24 = arith.constant 24 : index
    %c0_24 = arith.constant 0 : index
    %63 = vector.load %arg3[%c24, %c0_24] : memref<336x64xf32, #tpu.memory_space<vmem>>, vector<1x64xf32>
    %64 = vector.broadcast %63 : vector<1x64xf32> to vector<20x64xf32>
    %65 = arith.addf %62, %64 : vector<20x64xf32>
    %cst_25 = arith.constant 0.000000e+00 : f32
    %66 = vector.broadcast %cst_25 : f32 to vector<20x64xf32>
    %67 = arith.maximumf %65, %66 : vector<20x64xf32>
    %c272 = arith.constant 272 : index
    %c0_26 = arith.constant 0 : index
    %68 = vector.load %arg2[%c272, %c0_26] : memref<336x132xf32, #tpu.memory_space<vmem>>, vector<64x20xf32>
    %cst_27 = arith.constant dense<0.000000e+00> : vector<64x64xf32>
    %69 = tpu.matmul %68, %67, %cst_27 {dimension_numbers = #tpu.dot_dimension_numbers<[1], [0], [0], [1], [0, 0, 1, 1], [], []>} : vector<64x20xf32>, vector<20x64xf32>, vector<64x64xf32> -> vector<64x64xf32>
    %70 = vector.extract_strided_slice %69 {offsets = [0, 0], sizes = [32, 64], strides = [1, 1]} : vector<64x64xf32> to vector<32x64xf32>
    %71 = vector.extract_strided_slice %69 {offsets = [32, 0], sizes = [32, 64], strides = [1, 1]} : vector<64x64xf32> to vector<32x64xf32>
    %72 = arith.maximumf %70, %71 : vector<32x64xf32>
    %73 = vector.extract_strided_slice %72 {offsets = [0, 0], sizes = [8, 64], strides = [1, 1]} : vector<32x64xf32> to vector<8x64xf32>
    %74 = vector.extract_strided_slice %72 {offsets = [8, 0], sizes = [8, 64], strides = [1, 1]} : vector<32x64xf32> to vector<8x64xf32>
    %75 = vector.extract_strided_slice %72 {offsets = [16, 0], sizes = [8, 64], strides = [1, 1]} : vector<32x64xf32> to vector<8x64xf32>
    %76 = vector.extract_strided_slice %72 {offsets = [24, 0], sizes = [8, 64], strides = [1, 1]} : vector<32x64xf32> to vector<8x64xf32>
    %77 = tpu.concatenate %73, %74, %75, %76 in 1 : vector<8x64xf32>, vector<8x64xf32>, vector<8x64xf32>, vector<8x64xf32> -> vector<8x256xf32>
    %c32 = arith.constant 32 : index
    %c0_28 = arith.constant 0 : index
    %78 = vector.load %arg3[%c32, %c0_28] : memref<336x64xf32, #tpu.memory_space<vmem>>, vector<256x32xf32>
    %c288 = arith.constant 288 : index
    %c0_29 = arith.constant 0 : index
    %79 = vector.load %arg3[%c288, %c0_29] : memref<336x64xf32, #tpu.memory_space<vmem>>, vector<1x32xf32>
    %cst_30 = arith.constant dense<0.000000e+00> : vector<8x32xf32>
    %80 = tpu.matmul %77, %78, %cst_30 {dimension_numbers = #tpu.dot_dimension_numbers<[1], [0], [0], [1], [0, 0, 1, 1], [], []>} : vector<8x256xf32>, vector<256x32xf32>, vector<8x32xf32> -> vector<8x32xf32>
    %81 = vector.broadcast %79 : vector<1x32xf32> to vector<8x32xf32>
    %82 = arith.addf %80, %81 : vector<8x32xf32>
    %cst_31 = arith.constant 0.000000e+00 : f32
    %83 = vector.broadcast %cst_31 : f32 to vector<8x32xf32>
    %84 = arith.maximumf %82, %83 : vector<8x32xf32>
    %c296 = arith.constant 296 : index
    %c0_32 = arith.constant 0 : index
    %85 = vector.load %arg3[%c296, %c0_32] : memref<336x64xf32, #tpu.memory_space<vmem>>, vector<32x5xf32>
    %c328 = arith.constant 328 : index
    %c0_33 = arith.constant 0 : index
    %86 = vector.load %arg3[%c328, %c0_33] : memref<336x64xf32, #tpu.memory_space<vmem>>, vector<1x5xf32>
    %cst_34 = arith.constant dense<0.000000e+00> : vector<8x5xf32>
    %87 = tpu.matmul %84, %85, %cst_34 {dimension_numbers = #tpu.dot_dimension_numbers<[1], [0], [0], [1], [0, 0, 1, 1], [], []>} : vector<8x32xf32>, vector<32x5xf32>, vector<8x5xf32> -> vector<8x5xf32>
    %88 = vector.broadcast %86 : vector<1x5xf32> to vector<8x5xf32>
    %89 = arith.addf %87, %88 : vector<8x5xf32>
    %90 = vector.extract_strided_slice %89 {offsets = [0, 0], sizes = [2, 5], strides = [1, 1]} : vector<8x5xf32> to vector<2x5xf32>
    %c0_35 = arith.constant 0 : index
    %c0_36 = arith.constant 0 : index
    %91 = vector.load %arg4[%c0_35, %c0_36] : memref<2x5xf32, #tpu.memory_space<vmem>>, vector<2x5xf32>
    tpu.vector_store %arg4[%c0_35, %c0_36], %90 {strides = array<i32>} : memref<2x5xf32, #tpu.memory_space<vmem>>, vector<2x5xf32>,
    return
  }
}

</mosaic_0001>

<bundles_post_ra>
// kernel: tpu_custom_call.1
= control target key start
LH: loop header
LB: loop body
LE: loop exit
PB: predicated region body
PF: predicated region fallthrough
CT: control target
= control target key end

     0   :  { %vm52_vm0 = vcmask 1046528   ;;  %vm222_vm1 = vcmask 1044480   ;;  %s2014_s21 = smov 3   ;;  %s2015_s22 = smov 9   ;;  %vm137_vm2 = vcmask 1045504   ;;  %vm307_vm3 = vcmask 1043456   ;;  %s3262_s0 = inlined_call_operand.vmem [shape: f32[136,3], index: 0, kind: input, shape index: {}]   ;;  %s3263_s1 = inlined_call_operand.vmem [shape: f32[296,64], index: 1, kind: input, shape index: {}]   ;;  %s3264_s2 = inlined_call_operand.vmem [shape: f32[336,132], index: 2, kind: input, shape index: {}]   ;;  %s3265_s3 = inlined_call_operand.vmem [shape: f32[336,64], index: 3, kind: input, shape index: {}]   ;;  %s3266_s4 = inlined_call_operand.hbm [shape: f32[2,5], index: 4, kind: output, shape index: {}]  }
   0x1   :  { %v2054_v0 = vld [vmem:[%s3262_s0] sm:$0xff]  ;;  %v2059_v1 = vld [vmem:[%s3262_s0 + $0x8] sm:$0xff]  ;;  %v2070_v8 = vld [vmem:[%s3262_s0 + $0x10] sm:$0xff] }
   0x2   :  { %v53_v2 = vrot.slane %v2054_v0, 1  ;;  %v54_v3 = vrot.slane %v2059_v1, 1  ;;  %v223_v4 = vrot.slane %v2054_v0, 3  ;;  %v224_v5 = vrot.slane %v2059_v1, 3 }
   0x3   :  { %v56_v9 = vrot.slane %v2070_v8, 1  ;;  %v138_v10 = vrot.slane %v2054_v0, 2  ;;  %v139_v11 = vrot.slane %v2059_v1, 2  ;;  %v308_v12 = vrot.slane %v2054_v0, 4 }
   0x4   :  { %v55_v6 = vsel %vm52_vm0, %v53_v2, %v54_v3  ;;  %v225_v7 = vsel %vm222_vm1, %v223_v4, %v224_v5  ;;  %v309_v13 = vrot.slane %v2059_v1, 4 }
   0x5   :  { %86 = vrot.lane.b32.xlu0 %v55_v6, %s2014_s21  ;;  %256 = vrot.lane.b32.xlu1 %v225_v7, %s2015_s22  ;;  %v57_v14 = vsel %vm52_vm0, %v54_v3, %v56_v9 }
   0x6   :  { %88 = vrot.lane.b32.xlu2 %v57_v14, %s2014_s21 }
   0x7   :  { %9 = vsyncpa [#allocation3], 0  ;;  %v140_v15 = vsel %vm137_vm2, %v138_v10, %v139_v11  ;;  %v310_v16 = vsel %vm307_vm3, %v308_v12, %v309_v13  ;;  %v141_v17 = vrot.slane %v2070_v8, 2  ;;  %s2016_s23 = smov 6   ;;  %s2017_s24 = smov 12   ;;  %v226_v19 = vrot.slane %v2070_v8, 3 }
   0x8   :  { %v311_v20 = vrot.slane %v2070_v8, 4  ;;  %v2095_v23 = vld [vmem:[%s3262_s0 + $0x18] sm:$0xff]  ;;  %v2109_v30 = vld [vmem:[%s3262_s0 + $0x20] sm:$0xff]  ;;  %v2123_v37 = vld [vmem:[%s3262_s0 + $0x28] sm:$0xff]  ;;  %vm392_vm4 = vcmask 23552   ;;  %vm410_vm5 = vcmask 48128  }
   0x9   :  { %v142_v18 = vsel %vm137_vm2, %v139_v11, %v141_v17  ;;  %v227_v21 = vsel %vm222_vm1, %v224_v5, %v226_v19  ;;  %v58_v24 = vrot.slane %v2095_v23, 1  ;;  %v143_v26 = vrot.slane %v2095_v23, 2  ;;  %v2146_v50 = vld [vmem:[%s3262_s0 + $0x30] sm:$0xff]  ;;  %v2160_v57 = vld [vmem:[%s3262_s0 + $0x38] sm:$0xff]  ;;  %v2174_v2 = vld [vmem:[%s3262_s0 + $0x40] sm:$0xff]  ;;  %s2018_s28 = smov 24  }
   0xa   :  { %v312_v22 = vsel %vm307_vm3, %v309_v13, %v311_v20  ;;  %v228_v27 = vrot.slane %v2095_v23, 3  ;;  %v313_v31 = vrot.slane %v2095_v23, 4  ;;  %v60_v33 = vrot.slane %v2109_v30, 1  ;;  %s2019_s29 = smov 16   ;;  %s2020_s30 = smov 8  }
   0xb   :  { %v59_v25 = vsel %vm52_vm0, %v56_v9, %v58_v24  ;;  %v144_v28 = vsel %vm137_vm2, %v141_v17, %v143_v26  ;;  %v145_v34 = vrot.slane %v2109_v30, 2  ;;  %v230_v38 = vrot.slane %v2109_v30, 3  ;;  %s2021_s5 = smov 32   ;;  %s2023_s9 = smov 64  }
   0xc   :  { %v229_v29 = vsel %vm222_vm1, %v226_v19, %v228_v27  ;;  %v314_v32 = vsel %vm307_vm3, %v311_v20, %v313_v31  ;;  %v61_v35 = vsel %vm52_vm0, %v58_v24, %v60_v33  ;;  %v315_v40 = vrot.slane %v2109_v30, 4  ;;  %v2211_v24 = vld [vmem:[%s3262_s0 + $0x50] sm:$0xff]  ;;  %s2024_s18 = smov 96   ;;  %s2025_s17 = smov [#allocation2]  }
   0xd   :  { %171 = vrot.lane.b32.xlu0 %v140_v15, %s2016_s23  ;;  %341 = vrot.lane.b32.xlu1 %v310_v16, %s2017_s24  ;;  %v146_v36 = vsel %vm137_vm2, %v143_v26, %v145_v34  ;;  %v231_v39 = vsel %vm222_vm1, %v228_v27, %v230_v38  ;;  %v62_v41 = vrot.slane %v2123_v37, 1  ;;  %v147_v44 = vrot.slane %v2123_v37, 2  ;;  %v2197_v16 = vld [vmem:[%s3262_s0 + $0x48] sm:$0xff]  ;;  %s1863_s20 = sshll.u32 %s3266_s4, 4  ;;  %s1864_s20 = int_to_ptr.hbm [resolvable:$true] %s1863_s20 }
   0xe   :  { %173 = vrot.lane.b32.xlu2 %v142_v18, %s2016_s23  ;;  %v316_v42 = vsel %vm307_vm3, %v313_v31, %v315_v40  ;;  %v232_v46 = vrot.slane %v2123_v37, 3  ;;  %v317_v47 = vrot.slane %v2123_v37, 4  ;;  %v64_v51 = vrot.slane %v2146_v50, 1  ;;  %v464_v31 = vld [vmem:[%s3263_s1] sm:$0xff] }
   0xf   :  { %v63_v43 = vsel %vm52_vm0, %v60_v33, %v62_v41  ;;  %v148_v45 = vsel %vm137_vm2, %v145_v34, %v147_v44  ;;  %v149_v53 = vrot.slane %v2146_v50, 2  ;;  %v234_v54 = vrot.slane %v2146_v50, 3 }
  0x10   :  { %v233_v48 = vsel %vm222_vm1, %v230_v38, %v232_v46  ;;  %v318_v49 = vsel %vm307_vm3, %v315_v40, %v317_v47  ;;  %v65_v52 = vsel %vm52_vm0, %v62_v41, %v64_v51  ;;  %v319_v58 = vrot.slane %v2146_v50, 4 }
  0x11   :  { %v150_v55 = vsel %vm137_vm2, %v147_v44, %v149_v53  ;;  %v235_v56 = vsel %vm222_vm1, %v232_v46, %v234_v54  ;;  %v66_v60 = vrot.slane %v2160_v57, 1  ;;  %v151_v61 = vrot.slane %v2160_v57, 2 }
  0x12   :  { %v320_v59 = vsel %vm307_vm3, %v317_v47, %v319_v58  ;;  %v236_v3 = vrot.slane %v2160_v57, 3  ;;  %v321_v5 = vrot.slane %v2160_v57, 4  ;;  %v68_v6 = vrot.slane %v2174_v2, 1 }
  0x13   :  { %v67_v62 = vsel %vm52_vm0, %v64_v51, %v66_v60  ;;  %v152_v63 = vsel %vm137_vm2, %v149_v53, %v151_v61  ;;  %v153_v10 = vrot.slane %v2174_v2, 2  ;;  %v238_v12 = vrot.slane %v2174_v2, 3  ;;  %v2255_v51 = vld [vmem:[%s3262_s0 + $0x60] sm:$0xff] }
  0x14   :  { %v237_v4 = vsel %vm222_vm1, %v234_v54, %v236_v3  ;;  %v322_v7 = vsel %vm307_vm3, %v319_v58, %v321_v5  ;;  %v69_v9 = vsel %vm52_vm0, %v66_v60, %v68_v6  ;;  %v323_v13 = vrot.slane %v2174_v2, 4 }
  0x15   :  { %258 = vrot.lane.b32.xlu0 %v227_v21, %s2015_s22  ;;  %343 = vrot.lane.b32.xlu1 %v312_v22, %s2017_s24  ;;  %v154_v11 = vsel %vm137_vm2, %v151_v61, %v153_v10  ;;  %v239_v14 = vsel %vm222_vm1, %v236_v3, %v238_v12  ;;  %v70_v17 = vrot.slane %v2197_v16, 1  ;;  %v155_v19 = vrot.slane %v2197_v16, 2 }
  0x16   :  { %90 = vrot.lane.b32.xlu2 %v59_v25, %s2014_s21  ;;  %v324_v15 = vsel %vm307_vm3, %v321_v5, %v323_v13  ;;  %v240_v20 = vrot.slane %v2197_v16, 3  ;;  %v325_v25 = vrot.slane %v2197_v16, 4  ;;  %v72_v27 = vrot.slane %v2211_v24, 1 }
  0x17   :  { %v71_v18 = vsel %vm52_vm0, %v68_v6, %v70_v17  ;;  %v156_v21 = vsel %vm137_vm2, %v153_v10, %v155_v19  ;;  %v76_v53 = vrot.slane %v2255_v51, 1  ;;  %v331_v3 = vrot.slane %v2255_v51, 4 }
  0x18   :  { %v241_v22 = vsel %vm222_vm1, %v238_v12, %v240_v20  ;;  %v326_v26 = vsel %vm307_vm3, %v323_v13, %v325_v25  ;;  %vm428_vm6 = vcmask 72704   ;;  %vm446_vm7 = vcmask 97280  }
  0x19   :  { %vm468_vm8 = vcmask 121856   ;;  %vm644_vm9 = vcmask 31744   ;;  %vm1038_vm10 = vcmask 64512   ;;  %vm1048_vm11 = vcmask 130048  }
  0x1a   :  { %vm1058_vm12 = vcmask 195584   ;;  %vm1068_vm13 = vcmask 261120   ;;  %vm1085_vm14 = vcmask 326656   ;;  %vm1176_vm15 = vcmask 556032  }
  0x1d   :  { %175 = vrot.lane.b32.xlu0 %v144_v28, %s2016_s23  ;;  %260 = vrot.lane.b32.xlu1 %v229_v29, %s2015_s22  ;;  %v157_v28 = vrot.slane %v2211_v24, 2  ;;  %v465_v29 = vld [vmem:[%s3263_s1 + $0x8] sm:$0x7f] }
  0x1e   :  { %345 = vrot.lane.b32.xlu2 %v314_v32, %s2017_s24  ;;  %1872 = vmatpush.msk.msra.mxu0 %vm52_vm0, %v465_v29  ;;  %v73_v32 = vsel %vm52_vm0, %v70_v17, %v72_v27 }
  0x1f   :  { %v158_v33 = vsel %vm137_vm2, %v155_v19, %v157_v28 }
  0x20   :  { %538 = vmatpush.msra.mxu0 %v464_v31 }
  0x25   :  { %92 = vrot.lane.b32.xlu0 %v61_v35, %s2014_s21  ;;  %177 = vrot.lane.b32.xlu1 %v146_v36, %s2016_s23  ;;  %v2232_v35 = vld [vmem:[%s3262_s0 + $0x58] sm:$0xff]  ;;  %v242_v36 = vrot.slane %v2211_v24, 3 }
  0x26   :  { %262 = vrot.lane.b32.xlu2 %v231_v39, %s2015_s22  ;;  %v327_v39 = vrot.slane %v2211_v24, 4  ;;  %v74_v40 = vrot.slane %v2232_v35, 1  ;;  %v159_v44 = vrot.slane %v2232_v35, 2  ;;  %v244_v46 = vrot.slane %v2232_v35, 3 }
  0x27   :  { %v243_v38 = vsel %vm222_vm1, %v240_v20, %v242_v36  ;;  %v329_v47 = vrot.slane %v2232_v35, 4 }
  0x28   :  { %v328_v41 = vsel %vm307_vm3, %v325_v25, %v327_v39  ;;  %v77_v54 = vsel %vm52_vm0, %v74_v40, %v76_v53 }
  0x2d   :  { %347 = vrot.lane.b32.xlu0 %v316_v42, %s2017_s24  ;;  %94 = vrot.lane.b32.xlu1 %v63_v43, %s2014_s21  ;;  %v75_v42 = vsel %vm52_vm0, %v72_v27, %v74_v40 }
  0x2e   :  { %179 = vrot.lane.b32.xlu2 %v148_v45, %s2016_s23  ;;  %v160_v45 = vsel %vm137_vm2, %v157_v28, %v159_v44 }
  0x35   :  { %264 = vrot.lane.b32.xlu0 %v233_v48, %s2015_s22  ;;  %349 = vrot.lane.b32.xlu1 %v318_v49, %s2017_s24  ;;  %v245_v48 = vsel %vm222_vm1, %v242_v36, %v244_v46  ;;  %v330_v49 = vsel %vm307_vm3, %v327_v39, %v329_v47 }
  0x36   :  { %96 = vrot.lane.b32.xlu2 %v65_v52, %s2014_s21 }
  0x3d   :  { %181 = vrot.lane.b32.xlu0 %v150_v55, %s2016_s23  ;;  %266 = vrot.lane.b32.xlu1 %v235_v56, %s2015_s22  ;;  %v161_v55 = vrot.slane %v2255_v51, 2  ;;  %v246_v56 = vrot.slane %v2255_v51, 3 }
  0x3e   :  { %351 = vrot.lane.b32.xlu2 %v320_v59, %s2017_s24 }
  0x3f   :  { %v162_v60 = vsel %vm137_vm2, %v159_v44, %v161_v55  ;;  %v247_v61 = vsel %vm222_vm1, %v244_v46, %v246_v56  ;;  %v2323_v46 = vld [vmem:[%s3262_s0 + $0x78] sm:$0xff] }
  0x45   :  { %98 = vrot.lane.b32.xlu0 %v67_v62, %s2014_s21  ;;  %183 = vrot.lane.b32.xlu1 %v152_v63, %s2016_s23  ;;  %v2269_v63 = vld [vmem:[%s3262_s0 + $0x68] sm:$0xff] }
  0x46   :  { %268 = vrot.lane.b32.xlu2 %v237_v4, %s2015_s22  ;;  %v332_v4 = vsel %vm307_vm3, %v329_v47, %v331_v3  ;;  %v78_v5 = vrot.slane %v2269_v63, 1  ;;  %v163_v6 = vrot.slane %v2269_v63, 2 }
  0x4d   :  { %353 = vrot.lane.b32.xlu0 %v322_v7, %s2017_s24  ;;  %100 = vrot.lane.b32.xlu1 %v69_v9, %s2014_s21 }
  0x4e   :  { %185 = vrot.lane.b32.xlu2 %v154_v11, %s2016_s23 }
  0x55   :  { %270 = vrot.lane.b32.xlu0 %v239_v14, %s2015_s22  ;;  %355 = vrot.lane.b32.xlu1 %v324_v15, %s2017_s24  ;;  %v79_v14 = vsel %vm52_vm0, %v76_v53, %v78_v5  ;;  %v164_v15 = vsel %vm137_vm2, %v161_v55, %v163_v6  ;;  %v252_v53 = vrot.slane %v2323_v46, 3 }
  0x56   :  { %102 = vrot.lane.b32.xlu2 %v71_v18, %s2014_s21  ;;  %v248_v18 = vrot.slane %v2269_v63, 3 }
  0x58   :  { %v249_v20 = vsel %vm222_vm1, %v246_v56, %v248_v18 }
  0x5d   :  { %187 = vrot.lane.b32.xlu0 %v156_v21, %s2016_s23  ;;  %272 = vrot.lane.b32.xlu1 %v241_v22, %s2015_s22  ;;  %v333_v21 = vrot.slane %v2269_v63, 4 }
  0x5e   :  { %357 = vrot.lane.b32.xlu2 %v326_v26, %s2017_s24 }
  0x5f   :  { %v334_v29 = vsel %vm307_vm3, %v331_v3, %v333_v21 }
  0x60   :  { %v89_v34 = vpop.permute.xlu2 %88 }
  0x61   :  { %v394_v19 = vsel %vm392_vm4, %v2059_v1, %v89_v34 }
  0x65   :  { %104 = vrot.lane.b32.xlu0 %v73_v32, %s2014_s21  ;;  %189 = vrot.lane.b32.xlu1 %v158_v33, %s2016_s23 }
  0x66   :  { %274 = vrot.lane.b32.xlu2 %v243_v38, %s2015_s22 }
  0x68   :  { %v174_v43 = vpop.permute.xlu2 %173 }
  0x69   :  { %v412_v25 = vsel %vm410_vm5, %v394_v19, %v174_v43 }
  0x6d   :  { %359 = vrot.lane.b32.xlu0 %v328_v41, %s2017_s24  ;;  %106 = vrot.lane.b32.xlu1 %v75_v42, %s2014_s21 }
  0x6e   :  { %191 = vrot.lane.b32.xlu2 %v160_v45, %s2016_s23 }
  0x70   :  { %v91_v52 = vpop.permute.xlu2 %90 }
  0x71   :  { %v395_v34 = vsel %vm392_vm4, %v2070_v8, %v91_v52  ;;  %v167_v52 = vrot.slane %v2323_v46, 2 }
  0x75   :  { %276 = vrot.lane.b32.xlu0 %v245_v48, %s2015_s22  ;;  %361 = vrot.lane.b32.xlu1 %v330_v49, %s2017_s24  ;;  %v82_v48 = vrot.slane %v2323_v46, 1 }
  0x76   :  { %108 = vrot.lane.b32.xlu2 %v77_v54, %s2014_s21 }
  0x77   :  { %v87_v58 = vpop.permute.xlu0 %86  ;;  %v257_v59 = vpop.permute.xlu1 %256 }
  0x78   :  { %v346_v62 = vpop.permute.xlu2 %345  ;;  %v393_v7 = vsel %vm392_vm4, %v2054_v0, %v87_v58  ;;  %v2289_v0 = vld [vmem:[%s3262_s0 + $0x70] sm:$0xff] }
  0x79   :  { %v80_v22 = vrot.slane %v2289_v0, 1  ;;  %v165_v33 = vrot.slane %v2289_v0, 2  ;;  %v250_v38 = vrot.slane %v2289_v0, 3  ;;  %v335_v39 = vrot.slane %v2289_v0, 4 }
  0x7b   :  { %v81_v31 = vsel %vm52_vm0, %v78_v5, %v80_v22  ;;  %v166_v36 = vsel %vm137_vm2, %v163_v6, %v165_v33  ;;  %v251_v44 = vsel %vm222_vm1, %v248_v18, %v250_v38  ;;  %v336_v45 = vsel %vm307_vm3, %v333_v21, %v335_v39 }
  0x7c   :  { %v83_v49 = vsel %vm52_vm0, %v80_v22, %v82_v48  ;;  %v168_v58 = vsel %vm137_vm2, %v165_v33, %v167_v52 }
  0x7d   :  { %193 = vrot.lane.b32.xlu0 %v162_v60, %s2016_s23  ;;  %278 = vrot.lane.b32.xlu1 %v247_v61, %s2015_s22  ;;  %v2340_v61 = vld [vmem:[%s3262_s0 + $0x80] sm:$0xff] }
  0x7e   :  { %363 = vrot.lane.b32.xlu2 %v332_v4, %s2017_s24  ;;  %v84_v4 = vrot.slane %v2340_v61, 1  ;;  %v169_v5 = vrot.slane %v2340_v61, 2  ;;  %v339_v19 = vrot.slane %v2340_v61, 4 }
  0x7f   :  { %v172_v9 = vpop.permute.xlu0 %171  ;;  %v342_v10 = vpop.permute.xlu1 %341 }
  0x80   :  { %v411_v11 = vsel %vm410_vm5, %v393_v7, %v172_v9  ;;  %v263_v17 = vpop.permute.xlu2 %262 }
  0x81   :  { %v429_v12 = vsel %vm428_vm6, %v411_v11, %v257_v59  ;;  %v253_v59 = vsel %vm222_vm1, %v250_v38, %v252_v53  ;;  %v254_v11 = vrot.slane %v2340_v61, 3 }
  0x82   :  { %v447_v13 = vsel %vm446_vm7, %v429_v12, %v342_v10 }
  0x83   :  { %1873 = vmatmul.msk.f32.vlgmr.msra.gmra.mxu0 %vm468_vm8, %v447_v13  ;;  %v85_v13 = vsel %vm52_vm0, %v82_v48, %v84_v4  ;;  %v255_v18 = vsel %vm222_vm1, %v252_v53, %v254_v11 }
  0x85   :  { %110 = vrot.lane.b32.xlu0 %v79_v14, %s2014_s21  ;;  %195 = vrot.lane.b32.xlu1 %v164_v15, %s2016_s23  ;;  %v170_v14 = vsel %vm137_vm2, %v167_v52, %v169_v5 }
  0x86   :  { %280 = vrot.lane.b32.xlu2 %v249_v20, %s2015_s22 }
  0x87   :  { %v259_v26 = vpop.permute.xlu0 %258  ;;  %v344_v27 = vpop.permute.xlu1 %343 }
  0x88   :  { %v430_v28 = vsel %vm428_vm6, %v412_v25, %v259_v26  ;;  %v180_v32 = vpop.permute.xlu2 %179 }
  0x89   :  { %v448_v1 = vsel %vm446_vm7, %v430_v28, %v344_v27 }
  0x8b   :  { %1874 = vmatmul.msk.f32.gmra.mxu0 %vm468_vm8, %v448_v1 }
  0x8d   :  { %365 = vrot.lane.b32.xlu0 %v334_v29, %s2017_s24  ;;  %112 = vrot.lane.b32.xlu1 %v81_v31, %s2014_s21 }
  0x8e   :  { %197 = vrot.lane.b32.xlu2 %v166_v36, %s2016_s23 }
  0x8f   :  { %v176_v40 = vpop.permute.xlu0 %175  ;;  %v261_v41 = vpop.permute.xlu1 %260 }
  0x90   :  { %v413_v42 = vsel %vm410_vm5, %v395_v34, %v176_v40  ;;  %v97_v47 = vpop.permute.xlu2 %96 }
  0x91   :  { %v431_v43 = vsel %vm428_vm6, %v413_v42, %v261_v41  ;;  %v398_v27 = vsel %vm392_vm4, %v2123_v37, %v97_v47 }
  0x92   :  { %v449_v8 = vsel %vm446_vm7, %v431_v43, %v346_v62  ;;  %v337_v62 = vrot.slane %v2323_v46, 4 }
  0x93   :  { %1875 = vmatmul.msk.f32.gmra.mxu0 %vm468_vm8, %v449_v8 }
  0x94   :  { %v340_v25 = vsel %vm307_vm3, %v337_v62, %v339_v19 }
  0x95   :  { %282 = vrot.lane.b32.xlu0 %v251_v44, %s2015_s22  ;;  %367 = vrot.lane.b32.xlu1 %v336_v45, %s2017_s24 }
  0x96   :  { %114 = vrot.lane.b32.xlu2 %v83_v49, %s2014_s21 }
  0x97   :  { %v93_v54 = vpop.permute.xlu0 %92  ;;  %v178_v55 = vpop.permute.xlu1 %177 }
  0x98   :  { %v396_v56 = vsel %vm392_vm4, %v2095_v23, %v93_v54  ;;  %v352_v60 = vpop.permute.xlu2 %351  ;;  %v338_v23 = vsel %vm307_vm3, %v335_v39, %v337_v62 }
  0x99   :  { %v414_v3 = vsel %vm410_vm5, %v396_v56, %v178_v55 }
  0x9a   :  { %v432_v6 = vsel %vm428_vm6, %v414_v3, %v263_v17 }
  0x9d   :  { %199 = vrot.lane.b32.xlu0 %v168_v58, %s2016_s23  ;;  %284 = vrot.lane.b32.xlu1 %v253_v59, %s2015_s22 }
  0x9e   :  { %369 = vrot.lane.b32.xlu2 %v338_v23, %s2017_s24 }
  0x9f   :  { %v348_v7 = vpop.permute.xlu0 %347  ;;  %v95_v9 = vpop.permute.xlu1 %94 }
  0xa0   :  { %v450_v10 = vsel %vm446_vm7, %v432_v6, %v348_v7  ;;  %v397_v12 = vsel %vm392_vm4, %v2109_v30, %v95_v9  ;;  %v269_v15 = vpop.permute.xlu2 %268 }
  0xa1   :  { %1876 = vmatmul.msk.f32.gmra.mxu0 %vm468_vm8, %v450_v10  ;;  %v415_v17 = vsel %vm410_vm5, %v397_v12, %v180_v32 }
  0xa5   :  { %116 = vrot.lane.b32.xlu0 %v85_v13, %s2014_s21  ;;  %201 = vrot.lane.b32.xlu1 %v170_v14, %s2016_s23 }
  0xa6   :  { %286 = vrot.lane.b32.xlu2 %v255_v18, %s2015_s22 }
  0xa7   :  { %v265_v20 = vpop.permute.xlu0 %264  ;;  %v350_v21 = vpop.permute.xlu1 %349 }
  0xa8   :  { %v433_v22 = vsel %vm428_vm6, %v415_v17, %v265_v20  ;;  %v186_v26 = vpop.permute.xlu2 %185 }
  0xa9   :  { %v451_v30 = vsel %vm446_vm7, %v433_v22, %v350_v21 }
  0xaa   :  { %1877 = vmatmul.msk.f32.gmra.mxu0 %vm468_vm8, %v451_v30 }
  0xad   :  { %371 = vrot.lane.b32.xlu0 %v340_v25, %s2017_s24  ;;  %118 = vrot.lane.b32.xlu1 %v84_v4, %s2014_s21 }
  0xae   :  { %203 = vrot.lane.b32.xlu2 %v169_v5, %s2016_s23 }
  0xaf   :  { %v182_v28 = vpop.permute.xlu0 %181  ;;  %v267_v1 = vpop.permute.xlu1 %266 }
  0xb0   :  { %v416_v29 = vsel %vm410_vm5, %v398_v27, %v182_v28  ;;  %v103_v33 = vpop.permute.xlu2 %102 }
  0xb1   :  { %v434_v31 = vsel %vm428_vm6, %v416_v29, %v267_v1  ;;  %v401_v52 = vsel %vm392_vm4, %v2174_v2, %v103_v33 }
  0xb2   :  { %v452_v32 = vsel %vm446_vm7, %v434_v31, %v352_v60 }
  0xb3   :  { %1878 = vmatmul.msk.f32.gmra.mxu0 %vm468_vm8, %v452_v32 }
  0xb5   :  { %288 = vrot.lane.b32.xlu0 %v254_v11, %s2015_s22  ;;  %373 = vrot.lane.b32.xlu1 %v339_v19, %s2017_s24  ;;  %s2022_s24 = smov 48  }
  0xb7   :  { %v99_v37 = vpop.permute.xlu0 %98  ;;  %v184_v34 = vpop.permute.xlu1 %183 }
  0xb8   :  { %v399_v36 = vsel %vm392_vm4, %v2146_v50, %v99_v37  ;;  %v358_v39 = vpop.permute.xlu2 %357 }
  0xb9   :  { %v417_v38 = vsel %vm410_vm5, %v399_v36, %v184_v34 }
  0xba   :  { %v435_v40 = vsel %vm428_vm6, %v417_v38, %v269_v15 }
  0xbf   :  { %v354_v41 = vpop.permute.xlu0 %353  ;;  %v101_v42 = vpop.permute.xlu1 %100 }
  0xc0   :  { %v453_v43 = vsel %vm446_vm7, %v435_v40, %v354_v41  ;;  %v400_v8 = vsel %vm392_vm4, %v2160_v57, %v101_v42  ;;  %v275_v48 = vpop.permute.xlu2 %274 }
  0xc1   :  { %1879 = vmatmul.msk.f32.gmra.mxu0 %vm468_vm8, %v453_v43  ;;  %v418_v44 = vsel %vm410_vm5, %v400_v8, %v186_v26 }
  0xc7   :  { %v271_v45 = vpop.permute.xlu0 %270  ;;  %v356_v47 = vpop.permute.xlu1 %355 }
  0xc8   :  { %v436_v50 = vsel %vm428_vm6, %v418_v44, %v271_v45  ;;  %v192_v58 = vpop.permute.xlu2 %191 }
  0xc9   :  { %v454_v49 = vsel %vm446_vm7, %v436_v50, %v356_v47 }
  0xca   :  { %1880 = vmatmul.msk.f32.gmra.mxu0 %vm468_vm8, %v454_v49 }
  0xcf   :  { %v188_v53 = vpop.permute.xlu0 %187  ;;  %v273_v54 = vpop.permute.xlu1 %272 }
  0xd0   :  { %v419_v55 = vsel %vm410_vm5, %v401_v52, %v188_v53  ;;  %v109_v23 = vpop.permute.xlu2 %108 }
  0xd1   :  { %v437_v57 = vsel %vm428_vm6, %v419_v55, %v273_v54  ;;  %v404_v14 = vsel %vm392_vm4, %v2232_v35, %v109_v23 }
  0xd2   :  { %v455_v56 = vsel %vm446_vm7, %v437_v57, %v358_v39 }
  0xd3   :  { %1881 = vmatmul.msk.f32.gmra.mxu0 %vm468_vm8, %v455_v56 }
  0xd7   :  { %v105_v59 = vpop.permute.xlu0 %104  ;;  %v190_v60 = vpop.permute.xlu1 %189 }
  0xd8   :  { %v402_v62 = vsel %vm392_vm4, %v2197_v16, %v105_v59  ;;  %v364_v10 = vpop.permute.xlu2 %363 }
  0xd9   :  { %v420_v3 = vsel %vm410_vm5, %v402_v62, %v190_v60 }
  0xda   :  { %v438_v2 = vsel %vm428_vm6, %v420_v3, %v275_v48 }
  0xdf   :  { %v360_v4 = vpop.permute.xlu0 %359  ;;  %v107_v5 = vpop.permute.xlu1 %106 }
  0xe0   :  { %v456_v6 = vsel %vm446_vm7, %v438_v2, %v360_v4  ;;  %v403_v7 = vsel %vm392_vm4, %v2211_v24, %v107_v5  ;;  %v281_v19 = vpop.permute.xlu2 %280 }
  0xe1   :  { %1882 = vmatmul.msk.f32.gmra.mxu0 %vm468_vm8, %v456_v6  ;;  %v421_v9 = vsel %vm410_vm5, %v403_v7, %v192_v58 }
  0xe7   :  { %v277_v11 = vpop.permute.xlu0 %276  ;;  %v362_v12 = vpop.permute.xlu1 %361 }
  0xe8   :  { %v439_v16 = vsel %vm428_vm6, %v421_v9, %v277_v11  ;;  %v198_v25 = vpop.permute.xlu2 %197 }
  0xe9   :  { %v457_v13 = vsel %vm446_vm7, %v439_v16, %v362_v12  ;;  %v1982_v12 = vld [vmem:[%s3265_s3] ss:$0 sm:$0xff] }
  0xea   :  { %1883 = vmatmul.msk.f32.gmra.mxu0 %vm468_vm8, %v457_v13 }
  0xef   :  { %v194_v15 = vpop.permute.xlu0 %193  ;;  %v279_v17 = vpop.permute.xlu1 %278 }
  0xf0   :  { %v422_v18 = vsel %vm410_vm5, %v404_v14, %v194_v15  ;;  %v115_v31 = vpop.permute.xlu2 %114 }
  0xf1   :  { %v440_v24 = vsel %vm428_vm6, %v422_v18, %v279_v17  ;;  %v407_v36 = vsel %vm392_vm4, %v2289_v0, %v115_v31 }
  0xf2   :  { %v458_v20 = vsel %vm446_vm7, %v440_v24, %v364_v10 }
  0xf3   :  { %1884 = vmatmul.msk.f32.gmra.mxu0 %vm468_vm8, %v458_v20 }
  0xf7   :  { %v111_v21 = vpop.permute.xlu0 %110  ;;  %v196_v22 = vpop.permute.xlu1 %195 }
  0xf8   :  { %v405_v30 = vsel %vm392_vm4, %v2255_v51, %v111_v21  ;;  %v370_v38 = vpop.permute.xlu2 %369 }
  0xf9   :  { %v423_v26 = vsel %vm410_vm5, %v405_v30, %v196_v22 }
  0xfa   :  { %v441_v35 = vsel %vm428_vm6, %v423_v26, %v281_v19 }
  0xff   :  { %v366_v27 = vpop.permute.xlu0 %365  ;;  %v113_v28 = vpop.permute.xlu1 %112 }
 0x100   :  { %v459_v1 = vsel %vm446_vm7, %v441_v35, %v366_v27  ;;  %v406_v29 = vsel %vm392_vm4, %v2269_v63, %v113_v28  ;;  %v2431_v42 = vpop.f32.mrf.mxu0  ;;  %v287_v47 = vpop.permute.xlu2 %286  ;;  %v609_v28 = vld [vmem:[%s3264_s2 + $0x8] sm:$0xff] }
 0x101   :  { %1885 = vmatmul.msk.f32.gmra.mxu0 %vm468_vm8, %v459_v1  ;;  %v424_v32 = vsel %vm410_vm5, %v406_v29, %v198_v25 }
 0x107   :  { %v283_v33 = vpop.permute.xlu0 %282  ;;  %v368_v37 = vpop.permute.xlu1 %367 }
 0x108   :  { %v442_v51 = vsel %vm428_vm6, %v424_v32, %v283_v33  ;;  %v2437_v0 = vpop.f32.mrf.mxu0  ;;  %v204_v55 = vpop.permute.xlu2 %203 }
 0x109   :  { %v460_v34 = vsel %vm446_vm7, %v442_v51, %v368_v37 }
 0x10a   :  { %1886 = vmatmul.msk.f32.gmra.mxu0 %vm468_vm8, %v460_v34 }
 0x10f   :  { %v200_v39 = vpop.permute.xlu0 %199  ;;  %v285_v40 = vpop.permute.xlu1 %284 }
 0x110   :  { %v425_v41 = vsel %vm410_vm5, %v407_v36, %v200_v39  ;;  %v611_v36 = vld [vmem:[%s3264_s2 + $0x18] sm:$0xff] }
 0x111   :  { %v443_v63 = vsel %vm428_vm6, %v425_v41, %v285_v40 }
 0x112   :  { %v461_v43 = vsel %vm446_vm7, %v443_v63, %v370_v38 }
 0x113   :  { %1887 = vmatmul.msk.f32.gmra.mxu0 %vm468_vm8, %v461_v43 }
 0x117   :  { %v117_v8 = vpop.permute.xlu0 %116  ;;  %v202_v44 = vpop.permute.xlu1 %201 }
 0x118   :  { %v408_v45 = vsel %vm392_vm4, %v2323_v46, %v117_v8  ;;  %v2446_v46 = vpop.f32.mrf.mxu0  ;;  %v544_v8 = vadd.f32 %v1982_v12, %v2437_v0  ;;  %v608_v0 = vld [vmem:[%s3264_s2] sm:$0xff] }
 0x119   :  { %v426_v50 = vsel %vm410_vm5, %v408_v45, %v202_v44  ;;  %v547_v63 = vadd.f32 %v1982_v12, %v2446_v46  ;;  %v613_v45 = vld [vmem:[%s3264_s2 + $0x28] sm:$0xff] }
 0x11a   :  { %v444_v48 = vsel %vm428_vm6, %v426_v50, %v287_v47  ;;  %v541_v47 = vadd.f32 %v1982_v12, %v2431_v42  ;;  %v610_v42 = vld [vmem:[%s3264_s2 + $0x10] sm:$0xff]  ;;  %v621_v46 = vld [vmem:[%s3264_s2 + $0x68] sm:$0xff] }
 0x11b   :  { %v593_v50 = vmax.f32 %v547_v63, 0.0 }
 0x11f   :  { %v372_v49 = vpop.permute.xlu0 %371  ;;  %v119_v52 = vpop.permute.xlu1 %118 }
 0x120   :  { %v462_v53 = vsel %vm446_vm7, %v444_v48, %v372_v49  ;;  %v409_v54 = vsel %vm392_vm4, %v2340_v61, %v119_v52  ;;  %v549_v62 = vpop.f32.mrf.mxu0  ;;  %v592_v48 = vmax.f32 %v544_v8, 0.0  ;;  %v591_v49 = vmax.f32 %v541_v47, 0.0  ;;  %v615_v52 = vld [vmem:[%s3264_s2 + $0x38] sm:$0xff] }
 0x121   :  { %1888 = vmatmul.msk.f32.gmra.mxu0 %vm468_vm8, %v462_v53  ;;  %v427_v57 = vsel %vm410_vm5, %v409_v54, %v204_v55  ;;  %v550_v40 = vadd.f32 %v1982_v12, %v549_v62  ;;  %v617_v53 = vld [vmem:[%s3264_s2 + $0x48] sm:$0xff]  ;;  %v612_v54 = vld [vmem:[%s3264_s2 + $0x20] sm:$0xff]  ;;  %v619_v55 = vld [vmem:[%s3264_s2 + $0x58] sm:$0xff]  ;;  %vm1373_vm4 = vcmask 392192   ;;  %vm1379_vm5 = vcmask 523264  }
 0x122   :  { %v620_v62 = vld [vmem:[%s3264_s2 + $0x60] sm:$0xff] }
 0x123   :  { %v594_v44 = vmax.f32 %v550_v40, 0.0 }
 0x127   :  { %v289_v56 = vpop.permute.xlu0 %288  ;;  %v374_v59 = vpop.permute.xlu1 %373 }
 0x128   :  { %v445_v58 = vsel %vm428_vm6, %v427_v57, %v289_v56  ;;  %v552_v3 = vpop.f32.mrf.mxu0  ;;  %v614_v57 = vld [vmem:[%s3264_s2 + $0x30] sm:$0xff]  ;;  %v616_v56 = vld [vmem:[%s3264_s2 + $0x40] sm:$0xff]  ;;  %vm1397_vm6 = vcmask 654336  }
 0x129   :  { %v463_v60 = vsel %vm446_vm7, %v445_v58, %v374_v59  ;;  %v553_v38 = vadd.f32 %v1982_v12, %v552_v3  ;;  %v623_v58 = vld [vmem:[%s3264_s2 + $0x78] sm:$0xff]  ;;  %v618_v59 = vld [vmem:[%s3264_s2 + $0x50] sm:$0xff]  ;;  %vm1456_vm7 = vcmask 293888  }
 0x12a   :  { %1889 = vmatmul.msk.f32.gmra.mxu0 %vm468_vm8, %v463_v60  ;;  %v625_v60 = vld [vmem:[%s3264_s2 + $0x88] sm:$0xff]  ;;  %v627_v3 = vld [vmem:[%s3264_s2 + $0x98] sm:$0xff] }
 0x12b   :  { %v595_v43 = vmax.f32 %v553_v38, 0.0 }
 0x130   :  { %v555_v23 = vpop.f32.mrf.mxu0 }
 0x131   :  { %v556_v51 = vadd.f32 %v1982_v12, %v555_v23  ;;  %v622_v23 = vld [vmem:[%s3264_s2 + $0x70] sm:$0xff] }
 0x133   :  { %v596_v41 = vmax.f32 %v556_v51, 0.0 }
 0x13e   :  { %v558_v2 = vpop.f32.mrf.mxu0 }
 0x13f   :  { %v559_v33 = vadd.f32 %v1982_v12, %v558_v2  ;;  %v629_v2 = vld [vmem:[%s3264_s2 + $0xa8] sm:$0xff] }
 0x141   :  { %v597_v39 = vmax.f32 %v559_v33, 0.0 }
 0x147   :  { %v561_v4 = vpop.f32.mrf.mxu0 }
 0x148   :  { %v562_v31 = vadd.f32 %v1982_v12, %v561_v4  ;;  %v624_v4 = vld [vmem:[%s3264_s2 + $0x80] sm:$0xff] }
 0x14a   :  { %v598_v34 = vmax.f32 %v562_v31, 0.0 }
 0x150   :  { %v564_v5 = vpop.f32.mrf.mxu0 }
 0x151   :  { %v565_v1 = vadd.f32 %v1982_v12, %v564_v5  ;;  %v631_v5 = vld [vmem:[%s3264_s2 + $0xb8] sm:$0xff] }
 0x153   :  { %v599_v37 = vmax.f32 %v565_v1, 0.0 }
 0x15e   :  { %v567_v61 = vpop.f32.mrf.mxu0 }
 0x15f   :  { %v568_v26 = vadd.f32 %v1982_v12, %v567_v61  ;;  %v626_v61 = vld [vmem:[%s3264_s2 + $0x90] sm:$0xff] }
 0x161   :  { %v600_v32 = vmax.f32 %v568_v26, 0.0 }
 0x167   :  { %v570_v6 = vpop.f32.mrf.mxu0 }
 0x168   :  { %v571_v21 = vadd.f32 %v1982_v12, %v570_v6  ;;  %v633_v6 = vld [vmem:[%s3264_s2 + $0xc8] sm:$0xff] }
 0x16a   :  { %v601_v29 = vmax.f32 %v571_v21, 0.0  ;;  %v640_v21 = vld [vmem:[%s3264_s2 + $0x100] sm:$0xff] }
 0x170   :  { %v573_v7 = vpop.f32.mrf.mxu0 }
 0x171   :  { %v574_v24 = vadd.f32 %v1982_v12, %v573_v7  ;;  %v628_v7 = vld [vmem:[%s3264_s2 + $0xa0] sm:$0xff] }
 0x173   :  { %v602_v35 = vmax.f32 %v574_v24, 0.0 }
 0x17e   :  { %v576_v9 = vpop.f32.mrf.mxu0 }
 0x17f   :  { %v577_v18 = vadd.f32 %v1982_v12, %v576_v9  ;;  %v635_v9 = vld [vmem:[%s3264_s2 + $0xd8] sm:$0xff] }
 0x181   :  { %v603_v22 = vmax.f32 %v577_v18, 0.0 }
 0x187   :  { %v579_v10 = vpop.f32.mrf.mxu0 }
 0x188   :  { %v580_v15 = vadd.f32 %v1982_v12, %v579_v10  ;;  %v630_v10 = vld [vmem:[%s3264_s2 + $0xb0] sm:$0xff] }
 0x18a   :  { %v604_v20 = vmax.f32 %v580_v15, 0.0  ;;  %v641_v15 = vld [vmem:[%s3264_s2 + $0x108] sm:$0xff] }
 0x190   :  { %v582_v11 = vpop.f32.mrf.mxu0 }
 0x191   :  { %v583_v13 = vadd.f32 %v1982_v12, %v582_v11  ;;  %v637_v11 = vld [vmem:[%s3264_s2 + $0xe8] sm:$0xff] }
 0x193   :  { %v605_v19 = vmax.f32 %v583_v13, 0.0  ;;  %v643_v13 = vld [vmem:[%s3264_s2 + $0x118] sm:$0xff] }
 0x19e   :  { %v585_v16 = vpop.f32.mrf.mxu0 }
 0x19f   :  { %v586_v14 = vadd.f32 %v1982_v12, %v585_v16  ;;  %v639_v16 = vld [vmem:[%s3264_s2 + $0xf8] sm:$0xff] }
 0x1a1   :  { %v606_v17 = vmax.f32 %v586_v14, 0.0  ;;  %v634_v14 = vld [vmem:[%s3264_s2 + $0xd0] sm:$0xff] }
 0x1a3   :  { %702 = vmatpush.msra.mxu1 %v606_v17  ;;  %v636_v17 = vld [vmem:[%s3264_s2 + $0xe0] sm:$0xff] }
 0x1a5   :  { %703 = vmatpush.msra.mxu1 %v605_v19  ;;  %v638_v19 = vld [vmem:[%s3264_s2 + $0xf0] sm:$0xff] }
 0x1a7   :  { %704 = vmatpush.msra.mxu1 %v604_v20  ;;  %v588_v30 = vpop.f32.mrf.mxu0 }
 0x1a8   :  { %v589_v25 = vadd.f32 %v1982_v12, %v588_v30  ;;  %v632_v12 = vld [vmem:[%s3264_s2 + $0xc0] sm:$0xff] }
 0x1a9   :  { %705 = vmatpush.msra.mxu1 %v603_v22 }
 0x1aa   :  { %v607_v27 = vmax.f32 %v589_v25, 0.0  ;;  %v642_v25 = vld [vmem:[%s3264_s2 + $0x110] sm:$0xff] }
 0x1ab   :  { %706 = vmatpush.msra.mxu1 %v602_v35 }
 0x1ac   :  { %1890 = vmatpush.msk.msra.mxu2 %vm307_vm3, %v607_v27  ;;  %1954 = vmatpush.msk.msra.mxu3 %vm307_vm3, %v607_v27 }
 0x1ad   :  { %707 = vmatpush.msra.mxu1 %v601_v29  ;;  %1891 = vmatmul.msk.f32.vlgmr.msra.gmra.mxu2 %vm644_vm9, %v609_v28 }
 0x1ae   :  { %1908 = vmatmul.msk.f32.vlgmr.msra.gmra.mxu3 %vm644_vm9, %v643_v13 }
 0x1af   :  { %708 = vmatpush.msra.mxu1 %v600_v32 }
 0x1b1   :  { %709 = vmatpush.msra.mxu1 %v599_v37 }
 0x1b3   :  { %710 = vmatpush.msra.mxu1 %v598_v34 }
 0x1b5   :  { %711 = vmatpush.msra.mxu1 %v597_v39  ;;  %1892 = vmatmul.msk.f32.gmra.mxu2 %vm644_vm9, %v611_v36 }
 0x1b7   :  { %712 = vmatpush.msra.mxu1 %v596_v41 }
 0x1b9   :  { %713 = vmatpush.msra.mxu1 %v595_v43 }
 0x1bb   :  { %714 = vmatpush.msra.mxu1 %v594_v44 }
 0x1bd   :  { %715 = vmatpush.msra.mxu1 %v593_v50  ;;  %1893 = vmatmul.msk.f32.gmra.mxu2 %vm644_vm9, %v613_v45 }
 0x1bf   :  { %716 = vmatpush.msra.mxu1 %v592_v48 }
 0x1c1   :  { %717 = vmatpush.msra.mxu1 %v591_v49 }
 0x1c2   :  { %718 = vmatmul.f32.vlgmr.msra.gmra.mxu1 %v608_v0 }
 0x1c5   :  { %1894 = vmatmul.msk.f32.gmra.mxu2 %vm644_vm9, %v615_v52 }
 0x1ca   :  { %721 = vmatmul.f32.gmra.mxu1 %v610_v42 }
 0x1cd   :  { %1895 = vmatmul.msk.f32.gmra.mxu2 %vm644_vm9, %v617_v53 }
 0x1d2   :  { %724 = vmatmul.f32.gmra.mxu1 %v612_v54 }
 0x1d5   :  { %1896 = vmatmul.msk.f32.gmra.mxu2 %vm644_vm9, %v619_v55 }
 0x1da   :  { %727 = vmatmul.f32.gmra.mxu1 %v614_v57 }
 0x1dd   :  { %1897 = vmatmul.msk.f32.gmra.mxu2 %vm644_vm9, %v621_v46 }
 0x1e2   :  { %730 = vmatmul.f32.gmra.mxu1 %v616_v56 }
 0x1e5   :  { %1898 = vmatmul.msk.f32.gmra.mxu2 %vm644_vm9, %v623_v58 }
 0x1ea   :  { %733 = vmatmul.f32.gmra.mxu1 %v618_v59 }
 0x1ed   :  { %1899 = vmatmul.msk.f32.gmra.mxu2 %vm644_vm9, %v625_v60 }
 0x1f2   :  { %736 = vmatmul.f32.gmra.mxu1 %v620_v62 }
 0x1f5   :  { %1900 = vmatmul.msk.f32.gmra.mxu2 %vm644_vm9, %v627_v3 }
 0x1fa   :  { %739 = vmatmul.f32.gmra.mxu1 %v622_v23 }
 0x1fd   :  { %1901 = vmatmul.msk.f32.gmra.mxu2 %vm644_vm9, %v629_v2 }
 0x202   :  { %742 = vmatmul.f32.gmra.mxu1 %v624_v4 }
 0x205   :  { %1902 = vmatmul.msk.f32.gmra.mxu2 %vm644_vm9, %v631_v5 }
 0x20a   :  { %745 = vmatmul.f32.gmra.mxu1 %v626_v61 }
 0x20d   :  { %1903 = vmatmul.msk.f32.gmra.mxu2 %vm644_vm9, %v633_v6 }
 0x212   :  { %748 = vmatmul.f32.gmra.mxu1 %v628_v7 }
 0x215   :  { %1904 = vmatmul.msk.f32.gmra.mxu2 %vm644_vm9, %v635_v9 }
 0x21a   :  { %751 = vmatmul.f32.gmra.mxu1 %v630_v10 }
 0x21d   :  { %1905 = vmatmul.msk.f32.gmra.mxu2 %vm644_vm9, %v637_v11 }
 0x222   :  { %754 = vmatmul.f32.gmra.mxu1 %v632_v12 }
 0x225   :  { %1906 = vmatmul.msk.f32.gmra.mxu2 %vm644_vm9, %v639_v16 }
 0x22a   :  { %757 = vmatmul.f32.gmra.mxu1 %v634_v14 }
 0x22d   :  { %1907 = vmatmul.msk.f32.gmra.mxu2 %vm644_vm9, %v641_v15 }
 0x230   :  { %v790_v18 = vpop.f32.mrf.mxu2 }
 0x232   :  { %760 = vmatmul.f32.gmra.mxu1 %v636_v17 }
 0x238   :  { %v793_v24 = vpop.f32.mrf.mxu2 }
 0x23a   :  { %763 = vmatmul.f32.gmra.mxu1 %v638_v19 }
 0x23f   :  { %v719_v20 = vpop.f32.mrf.mxu1 }
 0x240   :  { %v796_v22 = vpop.f32.mrf.mxu2  ;;  %v791_v50 = vadd.f32 %v790_v18, %v719_v20 }
 0x242   :  { %766 = vmatmul.f32.gmra.mxu1 %v640_v21 }
 0x247   :  { %v722_v30 = vpop.f32.mrf.mxu1 }
 0x248   :  { %v799_v26 = vpop.f32.mrf.mxu2  ;;  %v794_v52 = vadd.f32 %v793_v24, %v722_v30 }
 0x24a   :  { %769 = vmatmul.f32.gmra.mxu1 %v642_v25 }
 0x24f   :  { %v725_v35 = vpop.f32.mrf.mxu1 }
 0x250   :  { %v802_v27 = vpop.f32.mrf.mxu2  ;;  %v797_v23 = vadd.f32 %v796_v22, %v725_v35 }
 0x257   :  { %v728_v28 = vpop.f32.mrf.mxu1 }
 0x258   :  { %v800_v1 = vadd.f32 %v799_v26, %v728_v28  ;;  %v805_v29 = vpop.f32.mrf.mxu2 }
 0x25f   :  { %v731_v31 = vpop.f32.mrf.mxu1 }
 0x260   :  { %v2585_v32 = vadd.f32 %v802_v27, %v731_v31  ;;  %v808_v33 = vpop.f32.mrf.mxu2 }
 0x267   :  { %v734_v37 = vpop.f32.mrf.mxu1 }
 0x268   :  { %v2587_v51 = vadd.f32 %v805_v29, %v734_v37  ;;  %v811_v34 = vpop.f32.mrf.mxu2 }
 0x26f   :  { %v737_v36 = vpop.f32.mrf.mxu1 }
 0x270   :  { %v2589_v38 = vadd.f32 %v808_v33, %v737_v36  ;;  %v814_v39 = vpop.f32.mrf.mxu2 }
 0x277   :  { %v740_v40 = vpop.f32.mrf.mxu1 }
 0x278   :  { %v2591_v41 = vadd.f32 %v811_v34, %v740_v40  ;;  %v817_v63 = vpop.f32.mrf.mxu2 }
 0x27f   :  { %v743_v43 = vpop.f32.mrf.mxu1 }
 0x280   :  { %v2593_v8 = vadd.f32 %v814_v39, %v743_v43  ;;  %v820_v44 = vpop.f32.mrf.mxu2 }
 0x287   :  { %v746_v45 = vpop.f32.mrf.mxu1 }
 0x288   :  { %v818_v47 = vadd.f32 %v817_v63, %v746_v45  ;;  %v823_v0 = vpop.f32.mrf.mxu2 }
 0x28a   :  { %v2595_v48 = vmax.f32 %v791_v50, %v818_v47 }
 0x28c   :  { %v950_v54 = vrot.slane %v2595_v48, 3  ;;  %v906_v55 = vrot.slane %v2595_v48, 2  ;;  %v862_v56 = vrot.slane %v2595_v48, 1  ;;  %v994_v9 = vrot.slane %v2595_v48, 4 }
 0x28f   :  { %v749_v49 = vpop.f32.mrf.mxu1 }
 0x290   :  { %v821_v42 = vadd.f32 %v820_v44, %v749_v49  ;;  %v826_v4 = vpop.f32.mrf.mxu2 }
 0x292   :  { %v2597_v53 = vmax.f32 %v794_v52, %v821_v42 }
 0x294   :  { %v951_v57 = vrot.slane %v2597_v53, 3  ;;  %v907_v46 = vrot.slane %v2597_v53, 2  ;;  %v863_v58 = vrot.slane %v2597_v53, 1  ;;  %v995_v61 = vrot.slane %v2597_v53, 4 }
 0x296   :  { %v952_v59 = vsel %vm222_vm1, %v950_v54, %v951_v57  ;;  %v908_v60 = vsel %vm137_vm2, %v906_v55, %v907_v46  ;;  %v864_v62 = vsel %vm52_vm0, %v862_v56, %v863_v58  ;;  %v996_v16 = vsel %vm307_vm3, %v994_v9, %v995_v61  ;;  %v841_v9 = vpop.f32.mrf.mxu3 }
 0x297   :  { %v752_v3 = vpop.f32.mrf.mxu1  ;;  %967 = vrot.lane.b32.xlu1 %v952_v59, %s2018_s28  ;;  %923 = vrot.lane.b32.xlu0 %v908_v60, %s2019_s29 }
 0x298   :  { %v824_v2 = vadd.f32 %v823_v0, %v752_v3  ;;  %879 = vrot.lane.b32.xlu2 %v864_v62, %s2020_s30  ;;  %v829_v17 = vpop.f32.mrf.mxu2 }
 0x29a   :  { %v2611_v5 = vmax.f32 %v797_v23, %v824_v2 }
 0x29c   :  { %v909_v6 = vrot.slane %v2611_v5, 2  ;;  %v865_v7 = vrot.slane %v2611_v5, 1  ;;  %v997_v15 = vrot.slane %v2611_v5, 4  ;;  %v953_v18 = vrot.slane %v2611_v5, 3 }
 0x29e   :  { %v910_v10 = vsel %vm137_vm2, %v907_v46, %v909_v6  ;;  %v866_v11 = vsel %vm52_vm0, %v863_v58, %v865_v7  ;;  %v998_v20 = vsel %vm307_vm3, %v995_v61, %v997_v15  ;;  %v954_v22 = vsel %vm222_vm1, %v951_v57, %v953_v18 }
 0x29f   :  { %v755_v12 = vpop.f32.mrf.mxu1  ;;  %925 = vrot.lane.b32.xlu1 %v910_v10, %s2019_s29  ;;  %881 = vrot.lane.b32.xlu0 %v866_v11, %s2020_s30 }
 0x2a0   :  { %v827_v13 = vadd.f32 %v826_v4, %v755_v12  ;;  %1011 = vrot.lane.b32.xlu2 %v996_v16, %s2021_s5  ;;  %v832_v27 = vpop.f32.mrf.mxu2 }
 0x2a2   :  { %v2623_v14 = vmax.f32 %v800_v1, %v827_v13 }
 0x2a4   :  { %v867_v19 = vrot.slane %v2623_v14, 1  ;;  %v999_v25 = vrot.slane %v2623_v14, 4  ;;  %v955_v26 = vrot.slane %v2623_v14, 3  ;;  %v911_v35 = vrot.slane %v2623_v14, 2 }
 0x2a6   :  { %v868_v24 = vsel %vm52_vm0, %v865_v7, %v867_v19  ;;  %v1000_v1 = vsel %vm307_vm3, %v997_v15, %v999_v25  ;;  %v956_v29 = vsel %vm222_vm1, %v953_v18, %v955_v26  ;;  %v912_v33 = vsel %vm137_vm2, %v909_v6, %v911_v35 }
 0x2a7   :  { %v758_v21 = vpop.f32.mrf.mxu1  ;;  %883 = vrot.lane.b32.xlu1 %v868_v24, %s2020_s30  ;;  %1013 = vrot.lane.b32.xlu0 %v998_v20, %s2021_s5 }
 0x2a8   :  { %969 = vrot.lane.b32.xlu2 %v954_v22, %s2018_s28  ;;  %v830_v30 = vadd.f32 %v829_v17, %v758_v21  ;;  %v835_v44 = vpop.f32.mrf.mxu2 }
 0x2aa   :  { %v2638_v28 = vmax.f32 %v2585_v32, %v830_v30 }
 0x2ac   :  { %v957_v34 = vrot.slane %v2638_v28, 3  ;;  %v913_v36 = vrot.slane %v2638_v28, 2  ;;  %v869_v32 = vrot.slane %v2638_v28, 1  ;;  %v1001_v49 = vrot.slane %v2638_v28, 4 }
 0x2ae   :  { %v958_v40 = vsel %vm222_vm1, %v955_v26, %v957_v34  ;;  %v914_v63 = vsel %vm137_vm2, %v911_v35, %v913_v36  ;;  %v870_v45 = vsel %vm52_vm0, %v867_v19, %v869_v32  ;;  %v1002_v54 = vsel %vm307_vm3, %v999_v25, %v1001_v49  ;;  %v1082_v25 = vld [vmem:[%s3263_s1 + $0x30] sm:$0xff]  ;;  %v1081_v26 = vld [vmem:[%s3263_s1 + $0x28] sm:$0xff] }
 0x2af   :  { %v761_v31 = vpop.f32.mrf.mxu1  ;;  %1015 = vrot.lane.b32.xlu1 %v1000_v1, %s2021_s5  ;;  %971 = vrot.lane.b32.xlu0 %v956_v29, %s2018_s28 }
 0x2b0   :  { %927 = vrot.lane.b32.xlu2 %v912_v33, %s2019_s29  ;;  %v833_v37 = vadd.f32 %v832_v27, %v761_v31  ;;  %v838_v59 = vpop.f32.mrf.mxu2  ;;  %1124 = vmatpush.msrb.mxu3 %v1082_v25  ;;  %v1080_v27 = vld [vmem:[%s3263_s1 + $0x20] sm:$0xff]  ;;  %v1079_v31 = vld [vmem:[%s3263_s1 + $0x18] sm:$0xff]  ;;  %v1078_v33 = vld [vmem:[%s3263_s1 + $0x10] sm:$0xff] }
 0x2b2   :  { %v2650_v39 = vmax.f32 %v2587_v51, %v833_v37  ;;  %1125 = vmatpush.msrb.mxu3 %v1081_v26 }
 0x2b4   :  { %v915_v50 = vrot.slane %v2650_v39, 2  ;;  %v871_v51 = vrot.slane %v2650_v39, 1  ;;  %v1003_v57 = vrot.slane %v2650_v39, 4  ;;  %v959_v46 = vrot.slane %v2650_v39, 3  ;;  %1126 = vmatpush.msrb.mxu3 %v1080_v27 }
 0x2b6   :  { %v916_v52 = vsel %vm137_vm2, %v913_v36, %v915_v50  ;;  %v872_v42 = vsel %vm52_vm0, %v869_v32, %v871_v51  ;;  %v1004_v58 = vsel %vm307_vm3, %v1001_v49, %v1003_v57  ;;  %v960_v60 = vsel %vm222_vm1, %v957_v34, %v959_v46  ;;  %1127 = vmatpush.msrb.mxu3 %v1079_v31 }
 0x2b7   :  { %v764_v43 = vpop.f32.mrf.mxu1  ;;  %973 = vrot.lane.b32.xlu1 %v958_v40, %s2018_s28  ;;  %929 = vrot.lane.b32.xlu0 %v914_v63, %s2019_s29 }
 0x2b8   :  { %885 = vrot.lane.b32.xlu2 %v870_v45, %s2020_s30  ;;  %v836_v47 = vadd.f32 %v835_v44, %v764_v43  ;;  %1128 = vmatpush.msrb.mxu3 %v1078_v33 }
 0x2ba   :  { %v2662_v0 = vmax.f32 %v2589_v38, %v836_v47 }
 0x2bc   :  { %v873_v55 = vrot.slane %v2662_v0, 1  ;;  %v1005_v3 = vrot.slane %v2662_v0, 4  ;;  %v961_v23 = vrot.slane %v2662_v0, 3  ;;  %v917_v2 = vrot.slane %v2662_v0, 2 }
 0x2be   :  { %v874_v56 = vsel %vm52_vm0, %v871_v51, %v873_v55  ;;  %v1006_v61 = vsel %vm307_vm3, %v1003_v57, %v1005_v3  ;;  %v962_v6 = vsel %vm222_vm1, %v959_v46, %v961_v23  ;;  %v918_v10 = vsel %vm137_vm2, %v915_v50, %v917_v2 }
 0x2bf   :  { %931 = vrot.lane.b32.xlu1 %v916_v52, %s2019_s29  ;;  %887 = vrot.lane.b32.xlu0 %v872_v42, %s2020_s30  ;;  %v767_v38 = vpop.f32.mrf.mxu1 }
 0x2c0   :  { %1017 = vrot.lane.b32.xlu2 %v1002_v54, %s2021_s5  ;;  %v839_v62 = vadd.f32 %v838_v59, %v767_v38 }
 0x2c2   :  { %v2683_v4 = vmax.f32 %v2591_v41, %v839_v62 }
 0x2c4   :  { %v963_v12 = vrot.slane %v2683_v4, 3  ;;  %v919_v41 = vrot.slane %v2683_v4, 2  ;;  %v875_v16 = vrot.slane %v2683_v4, 1  ;;  %v1007_v20 = vrot.slane %v2683_v4, 4 }
 0x2c6   :  { %v964_v15 = vsel %vm222_vm1, %v961_v23, %v963_v12  ;;  %v920_v17 = vsel %vm137_vm2, %v917_v2, %v919_v41  ;;  %v876_v18 = vsel %vm52_vm0, %v873_v55, %v875_v16  ;;  %v1008_v22 = vsel %vm307_vm3, %v1005_v3, %v1007_v20 }
 0x2c7   :  { %889 = vrot.lane.b32.xlu1 %v874_v56, %s2020_s30  ;;  %1019 = vrot.lane.b32.xlu0 %v1004_v58, %s2021_s5  ;;  %v770_v7 = vpop.f32.mrf.mxu1 }
 0x2c8   :  { %975 = vrot.lane.b32.xlu2 %v960_v60, %s2018_s28  ;;  %v842_v11 = vadd.f32 %v841_v9, %v770_v7 }
 0x2ca   :  { %v2695_v13 = vmax.f32 %v2593_v8, %v842_v11 }
 0x2cc   :  { %v921_v19 = vrot.slane %v2695_v13, 2  ;;  %v877_v24 = vrot.slane %v2695_v13, 1  ;;  %v1009_v30 = vrot.slane %v2695_v13, 4  ;;  %v965_v35 = vrot.slane %v2695_v13, 3 }
 0x2ce   :  { %v922_v8 = vsel %vm137_vm2, %v919_v41, %v921_v19  ;;  %v878_v21 = vsel %vm52_vm0, %v875_v16, %v877_v24  ;;  %v1010_v1 = vsel %vm307_vm3, %v1007_v20, %v1009_v30  ;;  %v966_v29 = vsel %vm222_vm1, %v963_v12, %v965_v35 }
 0x2cf   :  { %1021 = vrot.lane.b32.xlu1 %v1006_v61, %s2021_s5  ;;  %977 = vrot.lane.b32.xlu0 %v962_v6, %s2018_s28 }
 0x2d0   :  { %933 = vrot.lane.b32.xlu2 %v918_v10, %s2019_s29 }
 0x2d7   :  { %979 = vrot.lane.b32.xlu1 %v964_v15, %s2018_s28  ;;  %935 = vrot.lane.b32.xlu0 %v920_v17, %s2019_s29 }
 0x2d8   :  { %891 = vrot.lane.b32.xlu2 %v876_v18, %s2020_s30 }
 0x2df   :  { %937 = vrot.lane.b32.xlu1 %v922_v8, %s2019_s29  ;;  %893 = vrot.lane.b32.xlu0 %v878_v21, %s2020_s30 }
 0x2e0   :  { %1023 = vrot.lane.b32.xlu2 %v1008_v22, %s2021_s5 }
 0x2e7   :  { %895 = vrot.lane.b32.xlu1 %v877_v24, %s2020_s30  ;;  %1025 = vrot.lane.b32.xlu0 %v1010_v1, %s2021_s5 }
 0x2e8   :  { %981 = vrot.lane.b32.xlu2 %v966_v29, %s2018_s28 }
 0x2ef   :  { %1027 = vrot.lane.b32.xlu1 %v1009_v30, %s2021_s5  ;;  %983 = vrot.lane.b32.xlu0 %v965_v35, %s2018_s28 }
 0x2f0   :  { %939 = vrot.lane.b32.xlu2 %v921_v19, %s2019_s29 }
 0x2f2   :  { %v880_v37 = vpop.permute.xlu2 %879 }
 0x2f3   :  { %v1039_v32 = vsel %vm1038_vm10, %v2595_v48, %v880_v37 }
 0x2fa   :  { %v1012_v34 = vpop.permute.xlu2 %1011 }
 0x302   :  { %v970_v36 = vpop.permute.xlu2 %969 }
 0x309   :  { %v968_v40 = vpop.permute.xlu1 %967  ;;  %v924_v63 = vpop.permute.xlu0 %923 }
 0x30a   :  { %v1049_v43 = vsel %vm1048_vm11, %v1039_v32, %v924_v63  ;;  %v928_v47 = vpop.permute.xlu2 %927 }
 0x30b   :  { %v1059_v44 = vsel %vm1058_vm12, %v1049_v43, %v968_v40 }
 0x30c   :  { %v1069_v45 = vsel %vm1068_vm13, %v1059_v44, %v1012_v34 }
 0x30d   :  { %1909 = vmatmul.msk.f32.vlgmr.msrb.gmra.mxu3 %vm1085_vm14, %v1069_v45 }
 0x311   :  { %v926_v50 = vpop.permute.xlu1 %925  ;;  %v882_v51 = vpop.permute.xlu0 %881 }
 0x312   :  { %v1040_v49 = vsel %vm1038_vm10, %v2597_v53, %v882_v51  ;;  %v886_v52 = vpop.permute.xlu2 %885 }
 0x313   :  { %v1050_v48 = vsel %vm1048_vm11, %v1040_v49, %v926_v50  ;;  %v1042_v62 = vsel %vm1038_vm10, %v2623_v14, %v886_v52 }
 0x314   :  { %v1060_v55 = vsel %vm1058_vm12, %v1050_v48, %v970_v36 }
 0x319   :  { %v884_v42 = vpop.permute.xlu1 %883  ;;  %v1014_v54 = vpop.permute.xlu0 %1013 }
 0x31a   :  { %v1070_v57 = vsel %vm1068_vm13, %v1060_v55, %v1014_v54  ;;  %v1041_v46 = vsel %vm1038_vm10, %v2611_v5, %v884_v42  ;;  %v1018_v59 = vpop.permute.xlu2 %1017 }
 0x31b   :  { %1910 = vmatmul.msk.f32.gmra.mxu3 %vm1085_vm14, %v1070_v57  ;;  %v1051_v58 = vsel %vm1048_vm11, %v1041_v46, %v928_v47 }
 0x321   :  { %v1016_v38 = vpop.permute.xlu1 %1015  ;;  %v972_v56 = vpop.permute.xlu0 %971 }
 0x322   :  { %v1061_v53 = vsel %vm1058_vm12, %v1051_v58, %v972_v56  ;;  %v976_v61 = vpop.permute.xlu2 %975 }
 0x323   :  { %v1071_v60 = vsel %vm1068_vm13, %v1061_v53, %v1016_v38 }
 0x324   :  { %1911 = vmatmul.msk.f32.gmra.mxu3 %vm1085_vm14, %v1071_v60 }
 0x329   :  { %v974_v3 = vpop.permute.xlu1 %973  ;;  %v930_v23 = vpop.permute.xlu0 %929 }
 0x32a   :  { %v1052_v2 = vsel %vm1048_vm11, %v1042_v62, %v930_v23  ;;  %v934_v11 = vpop.permute.xlu2 %933 }
 0x32b   :  { %v1062_v5 = vsel %vm1058_vm12, %v1052_v2, %v974_v3 }
 0x32c   :  { %v1072_v6 = vsel %vm1068_vm13, %v1062_v5, %v1018_v59 }
 0x32d   :  { %1912 = vmatmul.msk.f32.gmra.mxu3 %vm1085_vm14, %v1072_v6 }
 0x331   :  { %v932_v7 = vpop.permute.xlu1 %931  ;;  %v888_v9 = vpop.permute.xlu0 %887 }
 0x332   :  { %v1043_v10 = vsel %vm1038_vm10, %v2638_v28, %v888_v9  ;;  %v892_v18 = vpop.permute.xlu2 %891 }
 0x333   :  { %v1053_v12 = vsel %vm1048_vm11, %v1043_v10, %v932_v7  ;;  %v1045_v21 = vsel %vm1038_vm10, %v2662_v0, %v892_v18  ;;  %v1173_v18 = vld [vmem:[%s3264_s2 + $0x190] sm:$0xff] }
 0x334   :  { %v1063_v16 = vsel %vm1058_vm12, %v1053_v12, %v976_v61  ;;  %v1167_v12 = vld [vmem:[%s3264_s2 + $0x130] sm:$0xff] }
 0x339   :  { %v890_v14 = vpop.permute.xlu1 %889  ;;  %v1020_v41 = vpop.permute.xlu0 %1019 }
 0x33a   :  { %v1073_v15 = vsel %vm1068_vm13, %v1063_v16, %v1020_v41  ;;  %v1044_v17 = vsel %vm1038_vm10, %v2650_v39, %v890_v14  ;;  %v1024_v26 = vpop.permute.xlu2 %1023  ;;  %v1168_v14 = vld [vmem:[%s3264_s2 + $0x140] sm:$0xff]  ;;  %v1169_v41 = vld [vmem:[%s3264_s2 + $0x150] sm:$0xff] }
 0x33b   :  { %1913 = vmatmul.msk.f32.gmra.mxu3 %vm1085_vm14, %v1073_v15  ;;  %v1054_v20 = vsel %vm1048_vm11, %v1044_v17, %v934_v11  ;;  %v1166_v11 = vld [vmem:[%s3264_s2 + $0x120] sm:$0xff]  ;;  %v1171_v15 = vld [vmem:[%s3264_s2 + $0x170] sm:$0xff] }
 0x33c   :  { %v1170_v16 = vld [vmem:[%s3264_s2 + $0x160] sm:$0xff] }
 0x33d   :  { %v1172_v17 = vld [vmem:[%s3264_s2 + $0x180] sm:$0xff] }
 0x341   :  { %v1022_v19 = vpop.permute.xlu1 %1021  ;;  %v978_v24 = vpop.permute.xlu0 %977 }
 0x342   :  { %v1064_v28 = vsel %vm1058_vm12, %v1054_v20, %v978_v24  ;;  %v982_v31 = vpop.permute.xlu2 %981  ;;  %v1175_v24 = vld [vmem:[%s3264_s2 + $0x1b0] sm:$0xff] }
 0x343   :  { %v1074_v8 = vsel %vm1068_vm13, %v1064_v28, %v1022_v19  ;;  %v1174_v19 = vld [vmem:[%s3264_s2 + $0x1a0] sm:$0xff] }
 0x344   :  { %1914 = vmatmul.msk.f32.gmra.mxu3 %vm1085_vm14, %v1074_v8 }
 0x349   :  { %v980_v22 = vpop.permute.xlu1 %979  ;;  %v936_v30 = vpop.permute.xlu0 %935 }
 0x34a   :  { %v1055_v25 = vsel %vm1048_vm11, %v1045_v21, %v936_v30  ;;  %v940_v40 = vpop.permute.xlu2 %939 }
 0x34b   :  { %v1065_v39 = vsel %vm1058_vm12, %v1055_v25, %v980_v22 }
 0x34c   :  { %v1075_v35 = vsel %vm1068_vm13, %v1065_v39, %v1024_v26 }
 0x34d   :  { %1915 = vmatmul.msk.f32.gmra.mxu3 %vm1085_vm14, %v1075_v35 }
 0x351   :  { %v938_v27 = vpop.permute.xlu1 %937  ;;  %v894_v1 = vpop.permute.xlu0 %893 }
 0x352   :  { %v1046_v29 = vsel %vm1038_vm10, %v2683_v4, %v894_v1 }
 0x353   :  { %v1056_v33 = vsel %vm1048_vm11, %v1046_v29, %v938_v27 }
 0x354   :  { %v1066_v34 = vsel %vm1058_vm12, %v1056_v33, %v982_v31 }
 0x359   :  { %v896_v0 = vpop.permute.xlu1 %895  ;;  %v1026_v37 = vpop.permute.xlu0 %1025 }
 0x35a   :  { %v1076_v36 = vsel %vm1068_vm13, %v1066_v34, %v1026_v37  ;;  %v1047_v32 = vsel %vm1038_vm10, %v2695_v13, %v896_v0  ;;  %v1983_v13 = vld [vmem:[%s3265_s3 + $0x8] ss:$0 sm:$0xff] }
 0x35b   :  { %1916 = vmatmul.msk.f32.gmra.mxu3 %vm1085_vm14, %v1076_v36  ;;  %v1057_v44 = vsel %vm1048_vm11, %v1047_v32, %v940_v40 }
 0x361   :  { %v1028_v63 = vpop.permute.xlu1 %1027  ;;  %v984_v43 = vpop.permute.xlu0 %983 }
 0x362   :  { %v1067_v4 = vsel %vm1058_vm12, %v1057_v44, %v984_v43 }
 0x363   :  { %v1077_v45 = vsel %vm1068_vm13, %v1067_v4, %v1028_v63 }
 0x364   :  { %1917 = vmatmul.msk.f32.gmra.mxu3 %vm1085_vm14, %v1077_v45 }
 0x390   :  { %v1130_v47 = vpop.f32.mrf.mxu3 }
 0x391   :  { %v1131_v6 = vadd.f32 %v1983_v13, %v1130_v47 }
 0x393   :  { %v1157_v10 = vmax.f32 %v1131_v6, 0.0 }
 0x39e   :  { %v1133_v50 = vpop.f32.mrf.mxu3 }
 0x39f   :  { %v1134_v5 = vadd.f32 %v1983_v13, %v1133_v50 }
 0x3a1   :  { %v1158_v9 = vmax.f32 %v1134_v5, 0.0 }
 0x3a7   :  { %v1136_v51 = vpop.f32.mrf.mxu3 }
 0x3a8   :  { %v1137_v23 = vadd.f32 %v1983_v13, %v1136_v51 }
 0x3aa   :  { %v1159_v7 = vmax.f32 %v1137_v23, 0.0 }
 0x3b0   :  { %v1139_v49 = vpop.f32.mrf.mxu3 }
 0x3b1   :  { %v1140_v62 = vadd.f32 %v1983_v13, %v1139_v49 }
 0x3b3   :  { %v1160_v61 = vmax.f32 %v1140_v62, 0.0 }
 0x3be   :  { %v1142_v48 = vpop.f32.mrf.mxu3 }
 0x3bf   :  { %v1143_v53 = vadd.f32 %v1983_v13, %v1142_v48  ;;  %v1394_v48 = vld [vmem:[%s3263_s1 + $0x80] sm:$0xff] }
 0x3c0   :  { %1955 = vmatpush.msrb.mxu2 %v1394_v48  ;;  %1419 = vmatpush.msrb.mxu0 %v1394_v48 }
 0x3c1   :  { %v1161_v2 = vmax.f32 %v1143_v53, 0.0 }
 0x3c7   :  { %v1145_v52 = vpop.f32.mrf.mxu3 }
 0x3c8   :  { %v1146_v58 = vadd.f32 %v1983_v13, %v1145_v52  ;;  %v1393_v52 = vld [vmem:[%s3263_s1 + $0x78] sm:$0xff] }
 0x3c9   :  { %1956 = vmatpush.msrb.mxu2 %v1393_v52  ;;  %1420 = vmatpush.msrb.mxu0 %v1393_v52 }
 0x3ca   :  { %v1162_v3 = vmax.f32 %v1146_v58, 0.0 }
 0x3d0   :  { %v1148_v42 = vpop.f32.mrf.mxu3 }
 0x3d1   :  { %v1149_v38 = vadd.f32 %v1983_v13, %v1148_v42 }
 0x3d3   :  { %v1163_v60 = vmax.f32 %v1149_v38, 0.0 }
 0x3de   :  { %v1151_v54 = vpop.f32.mrf.mxu3 }
 0x3df   :  { %v1152_v57 = vadd.f32 %v1983_v13, %v1151_v54  ;;  %v1392_v54 = vld [vmem:[%s3263_s1 + $0x70] sm:$0xff] }
 0x3e0   :  { %1957 = vmatpush.msrb.mxu2 %v1392_v54  ;;  %1421 = vmatpush.msrb.mxu0 %v1392_v54 }
 0x3e1   :  { %v1164_v59 = vmax.f32 %v1152_v57, 0.0 }
 0x3e7   :  { %v1154_v55 = vpop.f32.mrf.mxu3 }
 0x3e8   :  { %v1155_v46 = vadd.f32 %v1983_v13, %v1154_v55 }
 0x3ea   :  { %v1165_v56 = vmax.f32 %v1155_v46, 0.0 }
 0x3ec   :  { %1918 = vmatpush.msk.msra.mxu3 %vm307_vm3, %v1165_v56 }
 0x3ee   :  { %1218 = vmatpush.msra.mxu3 %v1164_v59 }
 0x3f0   :  { %1219 = vmatpush.msra.mxu3 %v1163_v60 }
 0x3f2   :  { %1220 = vmatpush.msra.mxu3 %v1162_v3 }
 0x3f4   :  { %1221 = vmatpush.msra.mxu3 %v1161_v2 }
 0x3f6   :  { %1222 = vmatpush.msra.mxu3 %v1160_v61 }
 0x3f8   :  { %1223 = vmatpush.msra.mxu3 %v1159_v7 }
 0x3fa   :  { %1224 = vmatpush.msra.mxu3 %v1158_v9 }
 0x3fc   :  { %1225 = vmatpush.msra.mxu3 %v1157_v10 }
 0x3fd   :  { %1919 = vmatmul.msk.f32.vlgmr.msra.gmra.mxu3 %vm1176_vm15, %v1166_v11  ;;  %v1391_v11 = vld [vmem:[%s3263_s1 + $0x68] sm:$0xff] }
 0x3fe   :  { %1958 = vmatpush.msrb.mxu2 %v1391_v11  ;;  %1422 = vmatpush.msrb.mxu0 %v1391_v11  ;;  %v1451_v11 = vld [vmem:[%s3264_s2 + $0x1d0] sm:$0xff] }
 0x405   :  { %1920 = vmatmul.msk.f32.gmra.mxu3 %vm1176_vm15, %v1167_v12  ;;  %v1390_v12 = vld [vmem:[%s3263_s1 + $0x60] sm:$0xff] }
 0x406   :  { %1959 = vmatpush.msrb.mxu2 %v1390_v12  ;;  %1423 = vmatpush.msrb.mxu0 %v1390_v12  ;;  %v1452_v12 = vld [vmem:[%s3264_s2 + $0x1e0] sm:$0xff] }
 0x40d   :  { %1921 = vmatmul.msk.f32.gmra.mxu3 %vm1176_vm15, %v1168_v14  ;;  %v1389_v14 = vld [vmem:[%s3263_s1 + $0x58] sm:$0xff] }
 0x40e   :  { %1960 = vmatpush.msrb.mxu2 %v1389_v14  ;;  %1424 = vmatpush.msrb.mxu0 %v1389_v14  ;;  %v1453_v14 = vld [vmem:[%s3264_s2 + $0x1f0] sm:$0xff] }
 0x415   :  { %1922 = vmatmul.msk.f32.gmra.mxu3 %vm1176_vm15, %v1169_v41  ;;  %v1388_v41 = vld [vmem:[%s3263_s1 + $0x50] sm:$0xff] }
 0x416   :  { %1961 = vmatpush.msrb.mxu2 %v1388_v41  ;;  %1425 = vmatpush.msrb.mxu0 %v1388_v41  ;;  %v1454_v41 = vld [vmem:[%s3264_s2 + $0x200] sm:$0xff] }
 0x41d   :  { %1923 = vmatmul.msk.f32.gmra.mxu3 %vm1176_vm15, %v1170_v16  ;;  %v1387_v16 = vld [vmem:[%s3263_s1 + $0x48] sm:$0xff] }
 0x41e   :  { %1962 = vmatpush.msrb.mxu2 %v1387_v16  ;;  %1426 = vmatpush.msrb.mxu0 %v1387_v16  ;;  %v1455_v16 = vld [vmem:[%s3264_s2 + $0x210] sm:$0xff] }
 0x425   :  { %1924 = vmatmul.msk.f32.gmra.mxu3 %vm1176_vm15, %v1171_v15  ;;  %v1386_v15 = vld [vmem:[%s3263_s1 + $0x40] sm:$0xff] }
 0x426   :  { %1963 = vmatpush.msrb.mxu2 %v1386_v15  ;;  %1427 = vmatpush.msrb.mxu0 %v1386_v15  ;;  %v1595_v15 = vld [vmem:[%s3263_s1 + $0x120] sm:$0xff] }
 0x427   :  { %1642 = vmatpush.msrb.mxu1 %v1595_v15 }
 0x42d   :  { %1925 = vmatmul.msk.f32.gmra.mxu3 %vm1176_vm15, %v1172_v17  ;;  %v1385_v17 = vld [vmem:[%s3263_s1 + $0x38] sm:$0xff] }
 0x42e   :  { %1964 = vmatpush.msrb.mxu2 %v1385_v17  ;;  %1428 = vmatpush.msrb.mxu0 %v1385_v17 }
 0x435   :  { %1926 = vmatmul.msk.f32.gmra.mxu3 %vm1176_vm15, %v1173_v18 }
 0x43d   :  { %1927 = vmatmul.msk.f32.gmra.mxu3 %vm1176_vm15, %v1174_v19 }
 0x445   :  { %1928 = vmatmul.msk.f32.gmra.mxu3 %vm1176_vm15, %v1175_v24 }
 0x480   :  { %v1227_v20 = vpop.f32.mrf.mxu3 }
 0x488   :  { %v1230_v28 = vpop.f32.mrf.mxu3 }
 0x490   :  { %v1233_v8 = vpop.f32.mrf.mxu3 }
 0x498   :  { %v1236_v21 = vpop.f32.mrf.mxu3 }
 0x4a0   :  { %v1239_v22 = vpop.f32.mrf.mxu3 }
 0x4a8   :  { %v1242_v30 = vpop.f32.mrf.mxu3 }
 0x4a9   :  { %v2885_v46 = vmax.f32 %v1227_v20, %v1242_v30 }
 0x4ab   :  { %v1315_v59 = vrot.slane %v2885_v46, 3  ;;  %v1291_v53 = vrot.slane %v2885_v46, 2  ;;  %v1267_v60 = vrot.slane %v2885_v46, 1  ;;  %v1339_v5 = vrot.slane %v2885_v46, 4 }
 0x4b0   :  { %v1245_v25 = vpop.f32.mrf.mxu3 }
 0x4b1   :  { %v2879_v13 = vmax.f32 %v1230_v28, %v1245_v25 }
 0x4b3   :  { %v1316_v38 = vrot.slane %v2879_v13, 3  ;;  %v1292_v56 = vrot.slane %v2879_v13, 2  ;;  %v1268_v58 = vrot.slane %v2879_v13, 1  ;;  %v1340_v2 = vrot.slane %v2879_v13, 4 }
 0x4b5   :  { %v1317_v62 = vsel %vm222_vm1, %v1315_v59, %v1316_v38  ;;  %v1293_v3 = vsel %vm137_vm2, %v1291_v53, %v1292_v56  ;;  %v1269_v23 = vsel %vm52_vm0, %v1267_v60, %v1268_v58  ;;  %v1341_v7 = vsel %vm307_vm3, %v1339_v5, %v1340_v2 }
 0x4b8   :  { %v1248_v26 = vpop.f32.mrf.mxu3 }
 0x4b9   :  { %v2835_v39 = vmax.f32 %v1233_v8, %v1248_v26 }
 0x4bb   :  { %v1318_v1 = vrot.slane %v2835_v39, 3  ;;  %v1294_v29 = vrot.slane %v2835_v39, 2  ;;  %v1270_v0 = vrot.slane %v2835_v39, 1  ;;  %v1342_v45 = vrot.slane %v2835_v39, 4 }
 0x4bd   :  { %v1295_v61 = vsel %vm137_vm2, %v1292_v56, %v1294_v29  ;;  %v1271_v6 = vsel %vm52_vm0, %v1268_v58, %v1270_v0  ;;  %v1343_v9 = vsel %vm307_vm3, %v1340_v2, %v1342_v45  ;;  %v1319_v10 = vsel %vm222_vm1, %v1316_v38, %v1318_v1  ;;  %v1984_v58 = vld [vmem:[%s3265_s3 + $0x10] ss:$0 sm:$0xff] }
 0x4c0   :  { %v1251_v35 = vpop.f32.mrf.mxu3 }
 0x4c1   :  { %v2837_v27 = vmax.f32 %v1236_v21, %v1251_v35 }
 0x4c3   :  { %v1320_v31 = vrot.slane %v2837_v27, 3  ;;  %v1296_v33 = vrot.slane %v2837_v27, 2  ;;  %v1272_v37 = vrot.slane %v2837_v27, 1  ;;  %v1344_v43 = vrot.slane %v2837_v27, 4 }
 0x4c5   :  { %v1321_v34 = vsel %vm222_vm1, %v1318_v1, %v1320_v31  ;;  %v1297_v36 = vsel %vm137_vm2, %v1294_v29, %v1296_v33  ;;  %v1273_v32 = vsel %vm52_vm0, %v1270_v0, %v1272_v37  ;;  %v1345_v47 = vsel %vm307_vm3, %v1342_v45, %v1344_v43 }
 0x4c6   :  { %1328 = vrot.lane.b32.xlu1 %v1321_v34, %s2022_s24  ;;  %1304 = vrot.lane.b32.xlu0 %v1297_v36, %s2021_s5 }
 0x4c7   :  { %1280 = vrot.lane.b32.xlu2 %v1273_v32, %s2019_s29 }
 0x4c8   :  { %v1254_v40 = vpop.f32.mrf.mxu3 }
 0x4c9   :  { %v2853_v63 = vmax.f32 %v1239_v22, %v1254_v40 }
 0x4cb   :  { %v1322_v44 = vrot.slane %v2853_v63, 3  ;;  %v1274_v4 = vrot.slane %v2853_v63, 1  ;;  %v1298_v50 = vrot.slane %v2853_v63, 2  ;;  %v1346_v42 = vrot.slane %v2853_v63, 4 }
 0x4cd   :  { %v1299_v51 = vsel %vm137_vm2, %v1296_v33, %v1298_v50  ;;  %v1275_v49 = vsel %vm52_vm0, %v1272_v37, %v1274_v4  ;;  %v1347_v55 = vsel %vm307_vm3, %v1344_v43, %v1346_v42  ;;  %v1323_v57 = vsel %vm222_vm1, %v1320_v31, %v1322_v44 }
 0x4ce   :  { %1332 = vrot.lane.b32.xlu0 %v1322_v44, %s2022_s24  ;;  %1284 = vrot.lane.b32.xlu1 %v1274_v4, %s2019_s29 }
 0x4cf   :  { %1352 = vrot.lane.b32.xlu2 %v1345_v47, %s2023_s9 }
 0x4d6   :  { %1306 = vrot.lane.b32.xlu1 %v1299_v51, %s2021_s5  ;;  %1282 = vrot.lane.b32.xlu0 %v1275_v49, %s2019_s29 }
 0x4d7   :  { %1308 = vrot.lane.b32.xlu2 %v1298_v50, %s2021_s5 }
 0x4de   :  { %1356 = vrot.lane.b32.xlu1 %v1346_v42, %s2023_s9  ;;  %1354 = vrot.lane.b32.xlu0 %v1347_v55, %s2023_s9 }
 0x4df   :  { %1330 = vrot.lane.b32.xlu2 %v1323_v57, %s2022_s24 }
 0x4e6   :  { %1324 = vrot.lane.b32.xlu1 %v1317_v62, %s2022_s24  ;;  %1300 = vrot.lane.b32.xlu0 %v1293_v3, %s2021_s5 }
 0x4e7   :  { %1276 = vrot.lane.b32.xlu2 %v1269_v23, %s2019_s29 }
 0x4ee   :  { %1302 = vrot.lane.b32.xlu1 %v1295_v61, %s2021_s5  ;;  %1278 = vrot.lane.b32.xlu0 %v1271_v6, %s2019_s29 }
 0x4ef   :  { %1348 = vrot.lane.b32.xlu2 %v1341_v7, %s2023_s9 }
 0x4f6   :  { %1350 = vrot.lane.b32.xlu0 %v1343_v9, %s2023_s9 }
 0x4f7   :  { %1326 = vrot.lane.b32.xlu2 %v1319_v10, %s2022_s24  ;;  %v1450_v10 = vld [vmem:[%s3264_s2 + $0x1c0] sm:$0xff] }
 0x521   :  { %v1281_v18 = vpop.permute.xlu2 %1280 }
 0x522   :  { %v1365_v24 = vsel %vm1048_vm11, %v2835_v39, %v1281_v18  ;;  %v1594_v18 = vld [vmem:[%s3263_s1 + $0x118] sm:$0xff] }
 0x523   :  { %1643 = vmatpush.msrb.mxu1 %v1594_v18 }
 0x529   :  { %v1353_v19 = vpop.permute.xlu2 %1352 }
 0x531   :  { %v1309_v22 = vpop.permute.xlu2 %1308 }
 0x538   :  { %v1329_v20 = vpop.permute.xlu1 %1328  ;;  %v1305_v28 = vpop.permute.xlu0 %1304 }
 0x539   :  { %v1370_v8 = vsel %vm1068_vm13, %v1365_v24, %v1305_v28  ;;  %v1331_v35 = vpop.permute.xlu2 %1330  ;;  %v1592_v24 = vld [vmem:[%s3263_s1 + $0x108] sm:$0xff] }
 0x53a   :  { %v1376_v21 = vsel %vm1373_vm4, %v1370_v8, %v1329_v20  ;;  %v1591_v8 = vld [vmem:[%s3263_s1 + $0x100] sm:$0xff] }
 0x53b   :  { %v1382_v30 = vsel %vm1379_vm5, %v1376_v21, %v1353_v19  ;;  %v1593_v19 = vld [vmem:[%s3263_s1 + $0x110] sm:$0xff]  ;;  %v1590_v21 = vld [vmem:[%s3263_s1 + $0xf8] sm:$0xff]  ;;  %1604 = vmatpush.msrb.mxu3 %v1591_v8 }
 0x53c   :  { %1931 = vmatmul.msk.f32.vlgmr.msrb.gmra.mxu2 %vm1397_vm6, %v1382_v30  ;;  %1644 = vmatpush.msrb.mxu1 %v1593_v19  ;;  %v1589_v30 = vld [vmem:[%s3263_s1 + $0xf0] sm:$0xff]  ;;  %v1985_v8 = vld [vmem:[%s3265_s3 + $0x18] ss:$0 sm:$0xff] }
 0x53d   :  { %1605 = vmatpush.msrb.mxu3 %v1590_v21 }
 0x53e   :  { %1645 = vmatpush.msrb.mxu1 %v1592_v24 }
 0x53f   :  { %1606 = vmatpush.msrb.mxu3 %v1589_v30 }
 0x540   :  { %v1333_v25 = vpop.permute.xlu0 %1332  ;;  %v1285_v26 = vpop.permute.xlu1 %1284 }
 0x541   :  { %v1277_v33 = vpop.permute.xlu2 %1276  ;;  %v1367_v32 = vsel %vm1048_vm11, %v2853_v63, %v1285_v26  ;;  %v1587_v26 = vld [vmem:[%s3263_s1 + $0xe0] sm:$0xff] }
 0x542   :  { %v1372_v40 = vsel %vm1068_vm13, %v1367_v32, %v1309_v22  ;;  %v1363_v43 = vsel %vm1048_vm11, %v2885_v46, %v1277_v33 }
 0x543   :  { %v1378_v4 = vsel %vm1373_vm4, %v1372_v40, %v1333_v25  ;;  %v1588_v25 = vld [vmem:[%s3263_s1 + $0xe8] sm:$0xff] }
 0x544   :  { %1607 = vmatpush.msrb.mxu3 %v1588_v25 }
 0x546   :  { %1608 = vmatpush.msrb.mxu3 %v1587_v26 }
 0x548   :  { %v1307_v1 = vpop.permute.xlu1 %1306  ;;  %v1283_v29 = vpop.permute.xlu0 %1282 }
 0x549   :  { %v1366_v39 = vsel %vm1048_vm11, %v2837_v27, %v1283_v29  ;;  %v1349_v50 = vpop.permute.xlu2 %1348 }
 0x54a   :  { %v1371_v31 = vsel %vm1068_vm13, %v1366_v39, %v1307_v1  ;;  %v1586_v1 = vld [vmem:[%s3263_s1 + $0xd8] sm:$0xff] }
 0x54b   :  { %v1377_v34 = vsel %vm1373_vm4, %v1371_v31, %v1331_v35  ;;  %v1585_v31 = vld [vmem:[%s3263_s1 + $0xd0] sm:$0xff]  ;;  %1609 = vmatpush.msrb.mxu3 %v1586_v1 }
 0x54d   :  { %1610 = vmatpush.msrb.mxu3 %v1585_v31 }
 0x550   :  { %v1357_v0 = vpop.permute.xlu1 %1356  ;;  %v1355_v37 = vpop.permute.xlu0 %1354 }
 0x551   :  { %v1383_v36 = vsel %vm1379_vm5, %v1377_v34, %v1355_v37  ;;  %v1384_v47 = vsel %vm1379_vm5, %v1378_v4, %v1357_v0  ;;  %v1327_v54 = vpop.permute.xlu2 %1326 }
 0x552   :  { %1932 = vmatmul.msk.f32.gmra.mxu2 %vm1397_vm6, %v1383_v36 }
 0x558   :  { %v1325_v27 = vpop.permute.xlu1 %1324  ;;  %v1301_v44 = vpop.permute.xlu0 %1300 }
 0x559   :  { %v1368_v45 = vsel %vm1068_vm13, %v1363_v43, %v1301_v44 }
 0x55a   :  { %v1374_v51 = vsel %vm1373_vm4, %v1368_v45, %v1325_v27  ;;  %1933 = vmatmul.msk.f32.gmra.mxu2 %vm1397_vm6, %v1384_v47  ;;  %v1584_v47 = vld [vmem:[%s3263_s1 + $0xc8] sm:$0xff] }
 0x55b   :  { %v1380_v63 = vsel %vm1379_vm5, %v1374_v51, %v1349_v50  ;;  %1611 = vmatpush.msrb.mxu3 %v1584_v47 }
 0x55c   :  { %1929 = vmatmul.msk.f32.vlgmr.msrb.gmra.mxu0 %vm1397_vm6, %v1380_v63 }
 0x560   :  { %v1279_v49 = vpop.permute.xlu0 %1278  ;;  %v1303_v48 = vpop.permute.xlu1 %1302 }
 0x561   :  { %v1364_v52 = vsel %vm1048_vm11, %v2879_v13, %v1279_v49 }
 0x562   :  { %v1369_v42 = vsel %vm1068_vm13, %v1364_v52, %v1303_v48 }
 0x563   :  { %v1375_v57 = vsel %vm1373_vm4, %v1369_v42, %v1327_v54 }
 0x568   :  { %v1351_v55 = vpop.permute.xlu0 %1350 }
 0x569   :  { %v1381_v46 = vsel %vm1379_vm5, %v1375_v57, %v1351_v55 }
 0x56a   :  { %1930 = vmatmul.msk.f32.gmra.mxu0 %vm1397_vm6, %v1381_v46  ;;  %v1583_v46 = vld [vmem:[%s3263_s1 + $0xc0] sm:$0xff] }
 0x56b   :  { %1612 = vmatpush.msrb.mxu3 %v1583_v46  ;;  %v1761_v46 = vld [vmem:[%s3265_s3 + $0x78] sm:$0xff] }
 0x5bf   :  { %v1436_v38 = vpop.f32.mrf.mxu2 }
 0x5c0   :  { %v1437_v62 = vadd.f32 %v1984_v58, %v1436_v38  ;;  %v1582_v38 = vld [vmem:[%s3263_s1 + $0xb8] sm:$0xff] }
 0x5c1   :  { %1613 = vmatpush.msrb.mxu3 %v1582_v38  ;;  %v1777_v38 = vld [vmem:[%s3265_s3 + $0xf8] sm:$0xff] }
 0x5c2   :  { %v1447_v2 = vmax.f32 %v1437_v62, 0.0 }
 0x5d5   :  { %v1439_v56 = vpop.f32.mrf.mxu2 }
 0x5d6   :  { %v1440_v53 = vadd.f32 %v1984_v58, %v1439_v56  ;;  %v1581_v56 = vld [vmem:[%s3263_s1 + $0xb0] sm:$0xff] }
 0x5d7   :  { %1614 = vmatpush.msrb.mxu3 %v1581_v56  ;;  %v1760_v56 = vld [vmem:[%s3265_s3 + $0x70] sm:$0xff] }
 0x5d8   :  { %v1448_v23 = vmax.f32 %v1440_v53, 0.0  ;;  %v1578_v53 = vld [vmem:[%s3263_s1 + $0x98] sm:$0xff] }
 0x5d9   :  { %v1430_v13 = vpop.f32.mrf.mxu0 }
 0x5da   :  { %v1431_v61 = vadd.f32 %v1984_v58, %v1430_v13  ;;  %v1576_v13 = vld [vmem:[%s3263_s1 + $0x88] sm:$0xff] }
 0x5dc   :  { %v1445_v9 = vmax.f32 %v1431_v61, 0.0 }
 0x5dd   :  { %v1442_v59 = vpop.f32.mrf.mxu2 }
 0x5de   :  { %v1443_v60 = vadd.f32 %v1984_v58, %v1442_v59  ;;  %v1579_v59 = vld [vmem:[%s3263_s1 + $0xa0] sm:$0xff] }
 0x5e0   :  { %v1449_v3 = vmax.f32 %v1443_v60, 0.0  ;;  %v1577_v60 = vld [vmem:[%s3263_s1 + $0x90] sm:$0xff] }
 0x5e2   :  { %1934 = vmatpush.msk.msra.mxu2 %vm307_vm3, %v1449_v3 }
 0x5e4   :  { %1490 = vmatpush.msra.mxu2 %v1448_v23 }
 0x5e6   :  { %1491 = vmatpush.msra.mxu2 %v1447_v2 }
 0x5e7   :  { %v1433_v5 = vpop.f32.mrf.mxu0 }
 0x5e8   :  { %v1434_v6 = vadd.f32 %v1984_v58, %v1433_v5  ;;  %v1580_v58 = vld [vmem:[%s3263_s1 + $0xa8] sm:$0xff] }
 0x5e9   :  { %1615 = vmatpush.msrb.mxu3 %v1580_v58  ;;  %v1776_v58 = vld [vmem:[%s3265_s3 + $0xf0] sm:$0xff] }
 0x5ea   :  { %v1446_v7 = vmax.f32 %v1434_v6, 0.0 }
 0x5eb   :  { %1616 = vmatpush.msrb.mxu3 %v1579_v59  ;;  %v1759_v59 = vld [vmem:[%s3265_s3 + $0x68] sm:$0xff] }
 0x5ec   :  { %1492 = vmatpush.msra.mxu2 %v1446_v7 }
 0x5ed   :  { %1617 = vmatpush.msrb.mxu3 %v1578_v53  ;;  %v1775_v53 = vld [vmem:[%s3265_s3 + $0xe8] sm:$0xff] }
 0x5ee   :  { %1493 = vmatpush.msra.mxu2 %v1445_v9 }
 0x5ef   :  { %1935 = vmatmul.msk.f32.vlgmr.msra.gmra.mxu2 %vm1456_vm7, %v1450_v10  ;;  %1618 = vmatpush.msrb.mxu3 %v1577_v60 }
 0x5f1   :  { %1619 = vmatpush.msrb.mxu3 %v1576_v13  ;;  %v1758_v13 = vld [vmem:[%s3265_s3 + $0x60] sm:$0xff] }
 0x5f7   :  { %1936 = vmatmul.msk.f32.gmra.mxu2 %vm1456_vm7, %v1451_v11 }
 0x5ff   :  { %1937 = vmatmul.msk.f32.gmra.mxu2 %vm1456_vm7, %v1452_v12 }
 0x607   :  { %1938 = vmatmul.msk.f32.gmra.mxu2 %vm1456_vm7, %v1453_v14 }
 0x60f   :  { %1939 = vmatmul.msk.f32.gmra.mxu2 %vm1456_vm7, %v1454_v41 }
 0x617   :  { %1940 = vmatmul.msk.f32.gmra.mxu2 %vm1456_vm7, %v1455_v16 }
 0x672   :  { %v1495_v17 = vpop.f32.mrf.mxu2 }
 0x67a   :  { %v1498_v20 = vpop.f32.mrf.mxu2 }
 0x682   :  { %v1501_v28 = vpop.f32.mrf.mxu2 }
 0x68a   :  { %v1504_v22 = vpop.f32.mrf.mxu2 }
 0x68b   :  { %v3014_v35 = vmax.f32 %v1495_v17, %v1504_v22 }
 0x68d   :  { %v1519_v33 = vrot.slane %v3014_v35, 1  ;;  %v1547_v0 = vrot.slane %v3014_v35, 3  ;;  %v1561_v37 = vrot.slane %v3014_v35, 4  ;;  %v1533_v34 = vrot.slane %v3014_v35, 2 }
 0x692   :  { %v1507_v29 = vpop.f32.mrf.mxu2 }
 0x693   :  { %v3019_v39 = vmax.f32 %v1498_v20, %v1507_v29 }
 0x695   :  { %v1520_v36 = vrot.slane %v3019_v39, 1  ;;  %v1548_v32 = vrot.slane %v3019_v39, 3  ;;  %v1562_v40 = vrot.slane %v3019_v39, 4  ;;  %v1534_v43 = vrot.slane %v3019_v39, 2 }
 0x697   :  { %v1521_v27 = vsel %vm52_vm0, %v1519_v33, %v1520_v36  ;;  %v1549_v44 = vsel %vm222_vm1, %v1547_v0, %v1548_v32  ;;  %v1563_v4 = vsel %vm307_vm3, %v1561_v37, %v1562_v40  ;;  %v1535_v45 = vsel %vm137_vm2, %v1533_v34, %v1534_v43  ;;  %v1659_v0 = vld [vmem:[%s3264_s2 + $0x220] sm:$0xff]  ;;  %v1660_v37 = vld [vmem:[%s3264_s2 + $0x230] sm:$0xff] }
 0x698   :  { %1524 = vrot.lane.b32.xlu1 %v1521_v27, %s2021_s5  ;;  %1552 = vrot.lane.b32.xlu0 %v1549_v44, %s2024_s18  ;;  %v1661_v34 = vld [vmem:[%s3264_s2 + $0x240] sm:$0xff]  ;;  %v1666_v27 = vld [vmem:[%s3264_s2 + $0x290] sm:$0xff] }
 0x699   :  { %1941 = vmatmul.msk.f32.vlgmr.msrb.gmra.mxu1 %vm1068_vm13, %v1563_v4  ;;  %1538 = vrot.lane.b32.xlu2 %v1535_v45, %s2023_s9 }
 0x69a   :  { %v1510_v50 = vpop.f32.mrf.mxu2 }
 0x69b   :  { %v1515_v51 = vmax.f32 %v1501_v28, %v1510_v50  ;;  %v1765_v50 = vld [vmem:[%s3265_s3 + $0x98] sm:$0xff] }
 0x69c   :  { %1784 = vmatpush.msrb.mxu2 %v1765_v50 }
 0x69d   :  { %v1522_v63 = vrot.slane %v1515_v51, 1  ;;  %v1550_v49 = vrot.slane %v1515_v51, 3  ;;  %v1564_v48 = vrot.slane %v1515_v51, 4  ;;  %v1536_v52 = vrot.slane %v1515_v51, 2 }
 0x69f   :  { %v1523_v42 = vsel %vm52_vm0, %v1520_v36, %v1522_v63  ;;  %v1551_v54 = vsel %vm222_vm1, %v1548_v32, %v1550_v49  ;;  %v1565_v55 = vsel %vm307_vm3, %v1562_v40, %v1564_v48  ;;  %v1537_v57 = vsel %vm137_vm2, %v1534_v43, %v1536_v52  ;;  %v1662_v36 = vld [vmem:[%s3264_s2 + $0x250] sm:$0xff]  ;;  %v1663_v32 = vld [vmem:[%s3264_s2 + $0x260] sm:$0xff] }
 0x6a0   :  { %1526 = vrot.lane.b32.xlu1 %v1523_v42, %s2021_s5  ;;  %1554 = vrot.lane.b32.xlu0 %v1551_v54, %s2024_s18  ;;  %vm1572_vm0 = vcmask 785408   ;;  %vm1667_vm1 = vcmask 162816   ;;  %v1664_v40 = vld [vmem:[%s3264_s2 + $0x270] sm:$0xff]  ;;  %v1665_v43 = vld [vmem:[%s3264_s2 + $0x280] sm:$0xff]  ;;  %vm1854_vm2 = vcmask 33792  }
 0x6a1   :  { %1942 = vmatmul.msk.f32.gmra.mxu1 %vm1068_vm13, %v1565_v55  ;;  %1540 = vrot.lane.b32.xlu2 %v1537_v57, %s2023_s9  ;;  %v1762_v55 = vld [vmem:[%s3265_s3 + $0x80] sm:$0xff] }
 0x6a2   :  { %v1778_v57 = vld [vmem:[%s3265_s3 + $0x100] sm:$0xff] }
 0x6a8   :  { %1528 = vrot.lane.b32.xlu1 %v1522_v63, %s2021_s5  ;;  %1556 = vrot.lane.b32.xlu0 %v1550_v49, %s2024_s18  ;;  %v1764_v63 = vld [vmem:[%s3265_s3 + $0x90] sm:$0xff]  ;;  %s1861_s18 = sshll.u32 %s2025_s17, 4  ;;  %s1862_s18 = int_to_ptr.vmem [resolvable:$true] %s1861_s18 }
 0x6a9   :  { %1943 = vmatmul.msk.f32.gmra.mxu1 %vm1068_vm13, %v1564_v48  ;;  %1542 = vrot.lane.b32.xlu2 %v1536_v52, %s2023_s9  ;;  %v1780_v49 = vld [vmem:[%s3265_s3 + $0x110] sm:$0xff]  ;;  %v1763_v48 = vld [vmem:[%s3265_s3 + $0x88] sm:$0xff] }
 0x6aa   :  { %v1779_v52 = vld [vmem:[%s3265_s3 + $0x108] sm:$0xff]  ;;  %1785 = vmatpush.msrb.mxu2 %v1764_v63 }
 0x6ac   :  { %1786 = vmatpush.msrb.mxu2 %v1763_v48 }
 0x6ae   :  { %1787 = vmatpush.msrb.mxu2 %v1762_v55 }
 0x6b0   :  { %1788 = vmatpush.msrb.mxu2 %v1761_v46 }
 0x6b2   :  { %1789 = vmatpush.msrb.mxu2 %v1760_v56 }
 0x6b4   :  { %1790 = vmatpush.msrb.mxu2 %v1759_v59 }
 0x6b6   :  { %1791 = vmatpush.msrb.mxu2 %v1758_v13 }
 0x6f3   :  { %v1539_v62 = vpop.permute.xlu2 %1538 }
 0x6fb   :  { %v1541_v6 = vpop.permute.xlu2 %1540 }
 0x703   :  { %v1543_v41 = vpop.permute.xlu2 %1542 }
 0x70a   :  { %v1525_v3 = vpop.permute.xlu1 %1524  ;;  %v1553_v23 = vpop.permute.xlu0 %1552 }
 0x70b   :  { %v1566_v2 = vsel %vm1068_vm13, %v3014_v35, %v1525_v3  ;;  %v1757_v3 = vld [vmem:[%s3265_s3 + $0x58] sm:$0xff] }
 0x70c   :  { %v1569_v5 = vsel %vm1379_vm5, %v1566_v2, %v1539_v62  ;;  %v1774_v62 = vld [vmem:[%s3265_s3 + $0xe0] sm:$0xff]  ;;  %v1756_v2 = vld [vmem:[%s3265_s3 + $0x50] sm:$0xff]  ;;  %1792 = vmatpush.msrb.mxu2 %v1757_v3 }
 0x70d   :  { %v1573_v61 = vsel %vm1572_vm0, %v1569_v5, %v1553_v23  ;;  %v1773_v23 = vld [vmem:[%s3265_s3 + $0xd8] sm:$0xff]  ;;  %v1772_v5 = vld [vmem:[%s3265_s3 + $0xd0] sm:$0xff] }
 0x70e   :  { %1620 = vmatmul.f32.vlgmr.msrb.gmra.mxu3 %v1573_v61  ;;  %v1755_v61 = vld [vmem:[%s3265_s3 + $0x48] sm:$0xff]  ;;  %1793 = vmatpush.msrb.mxu2 %v1756_v2 }
 0x710   :  { %1794 = vmatpush.msrb.mxu2 %v1755_v61 }
 0x712   :  { %v1527_v7 = vpop.permute.xlu1 %1526  ;;  %v1555_v9 = vpop.permute.xlu0 %1554 }
 0x713   :  { %v1567_v10 = vsel %vm1068_vm13, %v3019_v39, %v1527_v7 }
 0x714   :  { %v1570_v11 = vsel %vm1379_vm5, %v1567_v10, %v1541_v6  ;;  %v1771_v6 = vld [vmem:[%s3265_s3 + $0xc8] sm:$0xff]  ;;  %v1754_v10 = vld [vmem:[%s3265_s3 + $0x40] sm:$0xff] }
 0x715   :  { %v1574_v12 = vsel %vm1572_vm0, %v1570_v11, %v1555_v9  ;;  %v1770_v11 = vld [vmem:[%s3265_s3 + $0xc0] sm:$0xff]  ;;  %1795 = vmatpush.msrb.mxu2 %v1754_v10 }
 0x716   :  { %1623 = vmatmul.f32.gmra.mxu3 %v1574_v12  ;;  %v1647_v19 = vpop.f32.mrf.mxu1  ;;  %v1753_v12 = vld [vmem:[%s3265_s3 + $0x38] sm:$0xff] }
 0x717   :  { %1796 = vmatpush.msrb.mxu2 %v1753_v12 }
 0x71a   :  { %v1529_v14 = vpop.permute.xlu1 %1528  ;;  %v1557_v15 = vpop.permute.xlu0 %1556 }
 0x71b   :  { %v1568_v16 = vsel %vm1068_vm13, %v1515_v51, %v1529_v14  ;;  %v1781_v51 = vld [vmem:[%s3265_s3 + $0x118] sm:$0xff] }
 0x71c   :  { %v1571_v17 = vsel %vm1379_vm5, %v1568_v16, %v1543_v41  ;;  %1804 = vmatpush.msra.mxu3 %v1781_v51  ;;  %v1769_v14 = vld [vmem:[%s3265_s3 + $0xb8] sm:$0xff]  ;;  %v1752_v41 = vld [vmem:[%s3265_s3 + $0x30] sm:$0xff] }
 0x71d   :  { %v1575_v18 = vsel %vm1572_vm0, %v1571_v17, %v1557_v15  ;;  %v1768_v16 = vld [vmem:[%s3265_s3 + $0xb0] sm:$0xff]  ;;  %1797 = vmatpush.msrb.mxu2 %v1752_v41 }
 0x71e   :  { %1626 = vmatmul.f32.gmra.mxu3 %v1575_v18  ;;  %v1650_v20 = vpop.f32.mrf.mxu1 }
 0x71f   :  { %1805 = vmatpush.msra.mxu3 %v1780_v49 }
 0x721   :  { %1806 = vmatpush.msra.mxu3 %v1779_v52 }
 0x723   :  { %1807 = vmatpush.msra.mxu3 %v1778_v57 }
 0x725   :  { %1808 = vmatpush.msra.mxu3 %v1777_v38 }
 0x726   :  { %v1653_v26 = vpop.f32.mrf.mxu1 }
 0x727   :  { %1809 = vmatpush.msra.mxu3 %v1776_v58 }
 0x729   :  { %1810 = vmatpush.msra.mxu3 %v1775_v53 }
 0x72b   :  { %1811 = vmatpush.msra.mxu3 %v1774_v62 }
 0x72d   :  { %1812 = vmatpush.msra.mxu3 %v1773_v23 }
 0x72f   :  { %1813 = vmatpush.msra.mxu3 %v1772_v5 }
 0x731   :  { %1814 = vmatpush.msra.mxu3 %v1771_v6 }
 0x733   :  { %1815 = vmatpush.msra.mxu3 %v1770_v11 }
 0x735   :  { %1816 = vmatpush.msra.mxu3 %v1769_v14 }
 0x737   :  { %1817 = vmatpush.msra.mxu3 %v1768_v16 }
 0x791   :  { %v1621_v24 = vpop.f32.mrf.mxu3 }
 0x792   :  { %v1622_v30 = vadd.f32 %v1985_v8, %v1621_v24  ;;  %v1751_v24 = vld [vmem:[%s3265_s3 + $0x28] sm:$0xff] }
 0x793   :  { %1798 = vmatpush.msrb.mxu2 %v1751_v24 }
 0x794   :  { %v1648_v29 = vadd.f32 %v1647_v19, %v1622_v30 }
 0x796   :  { %v1656_v33 = vmax.f32 %v1648_v29, 0.0  ;;  %v1826_v29 = vld [vmem:[%s3265_s3 + $0x130] sm:$0xff] }
 0x799   :  { %v1624_v28 = vpop.f32.mrf.mxu3 }
 0x79a   :  { %v1625_v21 = vadd.f32 %v1985_v8, %v1624_v28  ;;  %v1750_v28 = vld [vmem:[%s3265_s3 + $0x20] sm:$0xff] }
 0x79b   :  { %1799 = vmatpush.msrb.mxu2 %v1750_v28 }
 0x79c   :  { %v1651_v35 = vadd.f32 %v1650_v20, %v1625_v21  ;;  %v1767_v20 = vld [vmem:[%s3265_s3 + $0xa8] sm:$0xff] }
 0x79d   :  { %1818 = vmatpush.msra.mxu3 %v1767_v20 }
 0x79e   :  { %v1657_v31 = vmax.f32 %v1651_v35, 0.0  ;;  %v1828_v35 = vld [vmem:[%s3265_s3 + $0x140] sm:$0xff] }
 0x79f   :  { %1846 = vmatpush.msra.mxu1 %v1828_v35 }
 0x7a1   :  { %v1627_v22 = vpop.f32.mrf.mxu3 }
 0x7a2   :  { %v1628_v25 = vadd.f32 %v1985_v8, %v1627_v22  ;;  %v1766_v8 = vld [vmem:[%s3265_s3 + $0xa0] sm:$0xff] }
 0x7a3   :  { %1819 = vmatpush.msra.mxu3 %v1766_v8 }
 0x7a4   :  { %v1654_v1 = vadd.f32 %v1653_v26, %v1628_v25 }
 0x7a6   :  { %v1658_v39 = vmax.f32 %v1654_v1, 0.0  ;;  %v1827_v1 = vld [vmem:[%s3265_s3 + $0x138] sm:$0xff] }
 0x7a7   :  { %1847 = vmatpush.msra.mxu1 %v1827_v1 }
 0x7a8   :  { %1944 = vmatpush.msk.msra.mxu0 %vm307_vm3, %v1658_v39  ;;  %v1825_v39 = vld [vmem:[%s3265_s3 + $0x128] sm:$0xff] }
 0x7a9   :  { %1848 = vmatpush.msra.mxu1 %v1826_v29 }
 0x7aa   :  { %1709 = vmatpush.msra.mxu0 %v1657_v31  ;;  %v1986_v31 = vld [vmem:[%s3265_s3 + $0x120] ss:$0 sm:$0xff] }
 0x7ab   :  { %1849 = vmatpush.msra.mxu1 %v1825_v39 }
 0x7ac   :  { %1710 = vmatpush.msra.mxu0 %v1656_v33 }
 0x7ad   :  { %1945 = vmatmul.msk.f32.vlgmr.msra.gmra.mxu0 %vm1667_vm1, %v1659_v0 }
 0x7b5   :  { %1946 = vmatmul.msk.f32.gmra.mxu0 %vm1667_vm1, %v1660_v37 }
 0x7bd   :  { %1947 = vmatmul.msk.f32.gmra.mxu0 %vm1667_vm1, %v1661_v34 }
 0x7c5   :  { %1948 = vmatmul.msk.f32.gmra.mxu0 %vm1667_vm1, %v1662_v36 }
 0x7cd   :  { %1949 = vmatmul.msk.f32.gmra.mxu0 %vm1667_vm1, %v1663_v32  ;;  %v1987_v32 = vld [vmem:[%s3265_s3 + $0x148] ss:$0 sm:$0xff] }
 0x7d5   :  { %1950 = vmatmul.msk.f32.gmra.mxu0 %vm1667_vm1, %v1664_v40 }
 0x7dd   :  { %1951 = vmatmul.msk.f32.gmra.mxu0 %vm1667_vm1, %v1665_v43 }
 0x7e5   :  { %1952 = vmatmul.msk.f32.gmra.mxu0 %vm1667_vm1, %v1666_v27 }
 0x82a   :  { %v3123_v44 = vpop.f32.mrf.mxu0 }
 0x832   :  { %v3125_v4 = vpop.f32.mrf.mxu0 }
 0x83a   :  { %v3127_v45 = vpop.f32.mrf.mxu0 }
 0x842   :  { %v3129_v47 = vpop.f32.mrf.mxu0 }
 0x84a   :  { %v3149_v42 = vpop.f32.mrf.mxu0 }
 0x84b   :  { %v1736_v54 = vmax.f32 %v3123_v44, %v3149_v42 }
 0x852   :  { %v1727_v60 = vpop.f32.mrf.mxu0 }
 0x853   :  { %v1737_v17 = vmax.f32 %v3125_v4, %v1727_v60 }
 0x85a   :  { %v1730_v7 = vpop.f32.mrf.mxu0 }
 0x85b   :  { %v1738_v9 = vmax.f32 %v3127_v45, %v1730_v7 }
 0x862   :  { %v1733_v15 = vpop.f32.mrf.mxu0 }
 0x863   :  { %v1739_v18 = vmax.f32 %v3129_v47, %v1733_v15 }
 0x865   :  { %v1977_v19 = vpack.i.bf16 %v1739_v18, %v1737_v17 }
 0x867   :  { %1978 = vrot.lane.b32.xlu1 %v1977_v19, %s2023_s9 }
 0x8d9   :  { %v1979_v21 = vpop.permute.xlu1 %1978 }
 0x8da   :  { %v1981_v22 = vunpack.i.h.bf16 %v1979_v21  ;;  %v1980_v30 = vunpack.i.l.bf16 %v1979_v21 }
 0x8dc   :  { %v1748_v25 = vsel %vm1379_vm5, %v1736_v54, %v1980_v30  ;;  %v1749_v26 = vsel %vm1379_vm5, %v1738_v9, %v1981_v22 }
 0x8dd   :  { %1800 = vmatmul.f32.vlgmr.msrb.gmra.mxu2 %v1748_v25  ;;  %1820 = vmatmul.f32.vlgmr.msra.gmra.mxu3 %v1749_v26 }
 0x960   :  { %v1801_v33 = vpop.f32.mrf.mxu2  ;;  %v1821_v37 = vpop.f32.mrf.mxu3 }
 0x961   :  { %v1802_v0 = vadd.f32 %v1986_v31, %v1801_v33 }
 0x963   :  { %v1822_v34 = vadd.f32 %v1821_v37, %v1802_v0 }
 0x965   :  { %v1824_v36 = vmax.f32 %v1822_v34, 0.0 }
 0x967   :  { %1953 = vmatmul.msk.f32.vlgmr.msra.gmra.mxu1 %vm1068_vm13, %v1824_v36 }
 0x9e4   :  { %v1851_v40 = vpop.f32.mrf.mxu1 }
 0x9e5   :  { %v1852_v43 = vadd.f32 %v1987_v32, %v1851_v40 }
 0x9e7   :  { %1855 = vst.msk [vmem:[#allocation2] sm:$0x3] %vm1854_vm2, %v1852_v43 }
 0x9e8   :  { %1866 = dma.vmem_to_hbm [thread:$0]  %s1862_s18, 32, %s1864_s20, [#allocation3]  }
 0x9e9   :  { %2012 = dma.done.wait [#allocation3], 32  }
 0x9ea   :  { %2013 = vsyncadd [#allocation3], 4294967264 }
 0x9eb   :  { %1871 = vsyncpa [#allocation3], 1 }

</bundles_post_ra>
